<compile_context>
chip_gen: v5e
topology: v5e:2x2
jax: 0.10.0
libtpu: 0.0.40
codegen_flags: <defaults>
</compile_context>

<pallas_src>
import functools

import jax
import jax.numpy as jnp
from jax import lax
from jax.experimental import pallas as pl
from jax.experimental.pallas import tpu as pltpu


def _resblock_kernel(x_ref, aff_ref, w1_ref, w2_ref, o_ref, xpad_ref,
                     *col_scratch, H, W, K, p, eps, lpad, Bt, use_im2col):
    C = aff_ref.shape[0]
    HW = H * W
    Lseg = lpad + HW + lpad            # per-sample flat padded segment length
    col_ref = col_scratch[0] if use_im2col else None

    # ---- border-column validity masks, generated in-kernel (f32) ----------
    w_idx = lax.broadcasted_iota(jnp.int32, (1, HW), 1) % W
    col_masks = []
    for kw in range(K):
        off = kw - p
        if off == 0:
            col_masks.append(None)
        else:
            valid = (w_idx + off >= 0) & (w_idx + off < W)
            col_masks.append(valid.astype(jnp.float32))

    # ---- zero only the halo strips of each sample's padded segment --------
    # (done every grid step: scratch is per-core and uninitialized on a core's
    #  first step, so a program_id==0 guard would be unsafe under megacore.)
    if lpad > 0:
        zeros_halo = jnp.zeros((C, lpad), xpad_ref.dtype)
        for s in range(Bt):
            base = s * Lseg
            xpad_ref[:, base:base + lpad] = zeros_halo
            xpad_ref[:, base + lpad + HW:base + Lseg] = zeros_halo

    inv_n = 1.0 / float(HW)

    def norm_relu_store(v, g_col, b_col, s):
        # InstanceNorm2d (biased variance, per-sample/per-channel stats) with
        # fused single-pass stats and the affine folded into scale/shift,
        # then ReLU, stored into sample s's padded segment.
        # NOTE: E[x^2]-E[x]^2 in f32 (clamped at 0) is fine for the
        # roughly-normalized activations seen here.
        g = aff_ref[:, g_col:g_col + 1]                    # (C, 1)
        be = aff_ref[:, b_col:b_col + 1]                   # (C, 1)
        s1 = jnp.sum(v, axis=1, keepdims=True)
        s2 = jnp.sum(v * v, axis=1, keepdims=True)
        mean = s1 * inv_n
        var = jnp.maximum(s2 * inv_n - mean * mean, 0.0)
        scale = lax.rsqrt(var + eps) * g                   # EUP rsqrt
        shift = be - mean * scale
        act = jnp.maximum(v * scale + shift, 0.0)          # ReLU fused
        base = s * Lseg + lpad
        xpad_ref[:, base:base + HW] = act

    def window(s, kh, kw):
        # Statically shifted (C, HW) window of sample s's padded activation.
        # Top/bottom out-of-image rows land in the zeroed halo; left/right
        # border crossings are masked (in f32).
        d = (kh - p) * W + (kw - p)
        base = s * Lseg + lpad + d
        win = xpad_ref[:, base:base + HW]
        m = col_masks[kw]
        if m is not None:
            win = win * m
        return win

    def conv(w_ref, bias_col):
        # 'same' conv over all Bt samples; bf16 operands, f32 accumulation.
        bias = aff_ref[:, bias_col:bias_col + 1]           # (C, 1)
        w = w_ref[...]                                     # (C, K*K*C) bf16
        if use_im2col:
            # Small C: one big im2col matmul, N = Bt*HW lanes wide.
            for s in range(Bt):
                for kh in range(K):
                    for kw in range(K):
                        t = kh * K + kw
                        col_ref[t * C:(t + 1) * C, s * HW:(s + 1) * HW] = (
                            window(s, kh, kw).astype(col_ref.dtype))
            y = jnp.dot(w, col_ref[...],
                        preferred_element_type=jnp.float32)    # (C, Bt*HW)
            return [y[:, s * HW:(s + 1) * HW] + bias for s in range(Bt)]
        # Large C: accumulate shifted-window matmuls directly -- no im2col
        # buffer or its 9x store/reload traffic.  Window rotates and MXU
        # pushes interleave across the unrolled tap loop.
        outs = []
        for s in range(Bt):
            acc = None
            for kh in range(K):
                for kw in range(K):
                    t = kh * K + kw
                    contrib = jnp.dot(
                        w[:, t * C:(t + 1) * C],
                        window(s, kh, kw).astype(w.dtype),
                        preferred_element_type=jnp.float32)    # (C, HW)
                    acc = contrib if acc is None else acc + contrib
            outs.append(acc + bias)
        return outs

    # norm1 -> relu -> conv1
    for s in range(Bt):
        norm_relu_store(x_ref[s].astype(jnp.float32), 0, 1, s)
    y1 = conv(w1_ref, 2)
    # norm2 -> relu -> conv2
    for s in range(Bt):
        norm_relu_store(y1[s], 3, 4, s)
    y2 = conv(w2_ref, 5)
    # residual add + lane-dense writeback
    for s in range(Bt):
        o_ref[s] = (y2[s] + x_ref[s].astype(jnp.float32)).astype(o_ref.dtype)


def _pick_batch_tile(B, HW):
    # Largest divisor of B that is <= 8 and still leaves >= 2 grid steps when
    # B >= 2 (keeps both v7x TensorCores fed); only pack multiple samples when
    # HW is lane-aligned.
    if HW % 128 != 0:
        return 1
    best = 1
    for bt in range(1, min(B, 8) + 1):
        if B % bt == 0 and (B == 1 or B // bt >= 2):
            best = bt
    return best


def _vmem_limit_bytes():
    # ~75% of physical VMEM: 48 MiB on v7x (64 MiB phys), 96 MiB on v5e/v6e
    # (128 MiB phys); conservative fallback if the query is unavailable.
    try:
        phys = int(pltpu.get_tpu_info().vmem_capacity_bytes)
    except Exception:
        phys = 64 * 1024 * 1024
    return max(32 * 1024 * 1024, min((phys * 3) // 4, 100 * 1024 * 1024))


def resblock2d_pallas(x_nchw, params, *, kernel_size, padding, eps=1e-5,
                      conv_dtype=jnp.bfloat16, batch_tile=None,
                      im2col_max_channels=64):
    """ResBlock2d forward.

    x_nchw: (B, C, H, W) float32.
    params: PyTorch-layout tensors
        (w1 (C,C,K,K), b1 (C,), g1 (C,), be1 (C,), w2, b2, g2, be2).
    """
    w1, b1, g1, be1, w2, b2, g2, be2 = params
    B, C, H, W = x_nchw.shape
    K, p = kernel_size, padding
    HW, KKC = H * W, K * K * C

    Bt = batch_tile if batch_tile is not None else _pick_batch_tile(B, HW)
    assert B % Bt == 0, (B, Bt)
    use_im2col = C < im2col_max_channels

    # Free reshape: NCHW -> (B, C, H*W); spatial sits on the lane axis.
    x = x_nchw.reshape(B, C, HW)

    # Conv weights -> (C_out, K*K*C_in) im2col layout (tap-major, cin-minor).
    def to_mat(w):
        return jnp.transpose(w, (0, 2, 3, 1)).reshape(C, KKC).astype(conv_dtype)
    w1m, w2m = to_mat(w1), to_mat(w2)

    # Per-channel affine params + conv biases packed as one (C, 6) array:
    # [g1, be1, b1, g2, be2, b2].
    aff = jnp.stack([g1, be1, b1, g2, be2, b2], axis=1).astype(jnp.float32)

    pad0 = p * W + p                                        # max |flat tap shift|
    lpad = ((pad0 + 127) // 128) * 128 if pad0 > 0 else 0   # lane-aligned halo
    Lseg = lpad + HW + lpad

    kernel = functools.partial(_resblock_kernel, H=H, W=W, K=K, p=p, eps=eps,
                               lpad=lpad, Bt=Bt, use_im2col=use_im2col)

    scratch_shapes = [pltpu.VMEM((C, Bt * Lseg), jnp.float32)]  # padded acts (f32)
    if use_im2col:
        scratch_shapes.append(pltpu.VMEM((KKC, Bt * HW), conv_dtype))

    out = pl.pallas_call(
        kernel,
        out_shape=jax.ShapeDtypeStruct((B, C, HW), x.dtype),
        grid_spec=pltpu.PrefetchScalarGridSpec(
            num_scalar_prefetch=0,
            grid=(B // Bt,),
            in_specs=[
                pl.BlockSpec((Bt, C, HW), lambda b: (b, 0, 0)),   # x
                pl.BlockSpec((C, 6), lambda b: (0, 0)),           # affine + biases
                pl.BlockSpec((C, KKC), lambda b: (0, 0)),         # w1 (im2col layout)
                pl.BlockSpec((C, KKC), lambda b: (0, 0)),         # w2
            ],
            out_specs=pl.BlockSpec((Bt, C, HW), lambda b: (b, 0, 0)),
            scratch_shapes=scratch_shapes,
        ),
        compiler_params=pltpu.CompilerParams(
            dimension_semantics=("parallel",),
            vmem_limit_bytes=_vmem_limit_bytes(),
        ),
    )(x, aff, w1m, w2m)

    return out.reshape(B, C, H, W)                           # free reshape


def _reference(x, params, *, kernel_size, padding, eps=1e-5):
    """Pure-JAX f32 reference of the PyTorch forward (for verification)."""
    w1, b1, g1, be1, w2, b2, g2, be2 = params

    def inorm(v, g, be):
        mean = jnp.mean(v, axis=(2, 3), keepdims=True)
        var = jnp.mean((v - mean) ** 2, axis=(2, 3), keepdims=True)
        vhat = (v - mean) / jnp.sqrt(var + eps)
        return vhat * g.reshape(1, -1, 1, 1) + be.reshape(1, -1, 1, 1)

    def conv(v, w, b):
        y = lax.conv_general_dilated(v, w, (1, 1),
                                     [(padding, padding), (padding, padding)],
                                     dimension_numbers=("NCHW", "OIHW", "NCHW"))
        return y + b.reshape(1, -1, 1, 1)

    out = jnp.maximum(inorm(x, g1, be1), 0.0)
    out = conv(out, w1, b1)
    out = jnp.maximum(inorm(out, g2, be2), 0.0)
    out = conv(out, w2, b2)
    return out + x


if __name__ == "__main__":
    def run_case(B, C, H, W, KSIZE, PAD, seed, atol, rtol):
        key = jax.random.PRNGKey(seed)
        kx, kw1, kb1, kw2, kb2, kg1, kbe1, kg2, kbe2 = jax.random.split(key, 9)
        x = jax.random.normal(kx, (B, C, H, W), jnp.float32)

        # Pre-round conv weights to bf16-representable values so the in-kernel
        # bf16 cast is exact and the f32 reference uses identical weights;
        # remaining deviation is activation quantization only.
        def bf16_round(a):
            return a.astype(jnp.bfloat16).astype(jnp.float32)

        w1 = bf16_round(0.1 * jax.random.normal(kw1, (C, C, KSIZE, KSIZE), jnp.float32))
        w2 = bf16_round(0.1 * jax.random.normal(kw2, (C, C, KSIZE, KSIZE), jnp.float32))
        b1 = 0.1 * jax.random.normal(kb1, (C,), jnp.float32)
        b2 = 0.1 * jax.random.normal(kb2, (C,), jnp.float32)
        g1 = 1.0 + 0.1 * jax.random.normal(kg1, (C,), jnp.float32)
        be1 = 0.1 * jax.random.normal(kbe1, (C,), jnp.float32)
        g2 = 1.0 + 0.1 * jax.random.normal(kg2, (C,), jnp.float32)
        be2 = 0.1 * jax.random.normal(kbe2, (C,), jnp.float32)
        params = (w1, b1, g1, be1, w2, b2, g2, be2)

        out = resblock2d_pallas(x, params, kernel_size=KSIZE, padding=PAD)
        out = jax.block_until_ready(out)
        ref = _reference(x, params, kernel_size=KSIZE, padding=PAD)
        assert out.shape == (B, C, H, W)
        err = float(jnp.max(jnp.abs(out - ref)))
        assert jnp.allclose(out, ref, atol=atol, rtol=rtol), (B, C, H, W, err)
        return err

    # Spec-sized case (B=2, C=4, 16x16): Bt=1 keeps 2 grid steps; im2col path.
    run_case(2, 4, 16, 16, 3, 1, seed=0, atol=5e-2, rtol=5e-2)
    # Batched case (B=4 -> Bt=2): exercises the multi-sample, lane-stacked
    # im2col path (conv N = Bt*HW = 512) while keeping 2 grid steps.
    run_case(4, 4, 16, 16, 3, 1, seed=1, atol=5e-2, rtol=5e-2)
    # Larger-C case: exercises the direct shifted-window accumulation path
    # (no im2col buffer); looser tolerance for the longer bf16 contraction.
    run_case(2, 64, 16, 16, 3, 1, seed=2, atol=1e-1, rtol=1e-1)

    print("KERNEL_OK")
</pallas_src>

<mosaic_0001>
module attributes {stable_mosaic.version = 11 : i64} {
  func.func @_resblock_kernel(%arg0: i32, %arg1: memref<1x4x256xf32, #tpu.memory_space<vmem>>, %arg2: memref<4x6xf32, #tpu.memory_space<vmem>>, %arg3: memref<4x36xbf16, #tpu.memory_space<vmem>>, %arg4: memref<4x36xbf16, #tpu.memory_space<vmem>>, %arg5: memref<1x4x256xf32, #tpu.memory_space<vmem>>, %arg6: memref<4x512xf32, #tpu.memory_space<vmem>>, %arg7: memref<36x256xbf16, #tpu.memory_space<vmem>>) attributes {dimension_semantics = [#tpu.dimension_semantics<parallel>], iteration_bounds = array<i64: 2>, scalar_prefetch = 0 : i64, scratch_operands = 2 : i64, tpu.core_type = #tpu.core_type<tc>, window_params = [{transform_indices = @transform_0, window_bounds = array<i64: 1, 4, 256>}, {pipeline_mode = #tpu.pipeline_mode<synchronous>, transform_indices = @transform_1, window_bounds = array<i64: 4, 6>}, {pipeline_mode = #tpu.pipeline_mode<synchronous>, transform_indices = @transform_2, window_bounds = array<i64: 4, 36>}, {pipeline_mode = #tpu.pipeline_mode<synchronous>, transform_indices = @transform_3, window_bounds = array<i64: 4, 36>}, {transform_indices = @transform_4, window_bounds = array<i64: 1, 4, 256>}]} {
    %0 = tpu.iota {dimensions = array<i32: 1>} : vector<1x256xi32>
    %c16_i32 = arith.constant 16 : i32
    %c0_i32 = arith.constant 0 : i32
    %1 = arith.cmpi eq, %c16_i32, %c0_i32 : i32
    %c1_i32 = arith.constant 1 : i32
    %2 = arith.select %1, %c1_i32, %c16_i32 : i32
    %3 = vector.broadcast %2 : i32 to vector<1x256xi32>
    %4 = arith.remsi %0, %3 : vector<1x256xi32>
    %c0_i32_0 = arith.constant 0 : i32
    %5 = vector.broadcast %c0_i32_0 : i32 to vector<1x256xi32>
    %6 = arith.cmpi ne, %4, %5 : vector<1x256xi32>
    %c0_i32_1 = arith.constant 0 : i32
    %7 = vector.broadcast %c0_i32_1 : i32 to vector<1x256xi32>
    %8 = arith.cmpi slt, %4, %7 : vector<1x256xi32>
    %c0_i32_2 = arith.constant 0 : i32
    %9 = arith.cmpi slt, %2, %c0_i32_2 : i32
    %10 = vector.broadcast %9 : i1 to vector<1x256xi1>
    %11 = vector.broadcast %10 : vector<1x256xi1> to vector<1x256xi1>
    %12 = arith.xori %8, %11 : vector<1x256xi1>
    %13 = arith.andi %12, %6 : vector<1x256xi1>
    %14 = vector.broadcast %2 : i32 to vector<1x256xi32>
    %15 = arith.addi %4, %14 : vector<1x256xi32>
    %16 = arith.select %13, %15, %4 : vector<1x256xi1>, vector<1x256xi32>
    %c-1_i32 = arith.constant -1 : i32
    %17 = vector.broadcast %c-1_i32 : i32 to vector<1x256xi32>
    %18 = arith.addi %16, %17 : vector<1x256xi32>
    %c0_i32_3 = arith.constant 0 : i32
    %19 = vector.broadcast %c0_i32_3 : i32 to vector<1x256xi32>
    %20 = arith.cmpi sge, %18, %19 : vector<1x256xi32>
    %c-1_i32_4 = arith.constant -1 : i32
    %21 = vector.broadcast %c-1_i32_4 : i32 to vector<1x256xi32>
    %22 = arith.addi %16, %21 : vector<1x256xi32>
    %c16_i32_5 = arith.constant 16 : i32
    %23 = vector.broadcast %c16_i32_5 : i32 to vector<1x256xi32>
    %24 = arith.cmpi slt, %22, %23 : vector<1x256xi32>
    %25 = arith.andi %20, %24 : vector<1x256xi1>
    %26 = arith.extui %25 : vector<1x256xi1> to vector<1x256xi32>
    %27 = arith.sitofp %26 : vector<1x256xi32> to vector<1x256xf32>
    %c1_i32_6 = arith.constant 1 : i32
    %28 = vector.broadcast %c1_i32_6 : i32 to vector<1x256xi32>
    %29 = arith.addi %16, %28 : vector<1x256xi32>
    %c0_i32_7 = arith.constant 0 : i32
    %30 = vector.broadcast %c0_i32_7 : i32 to vector<1x256xi32>
    %31 = arith.cmpi sge, %29, %30 : vector<1x256xi32>
    %c1_i32_8 = arith.constant 1 : i32
    %32 = vector.broadcast %c1_i32_8 : i32 to vector<1x256xi32>
    %33 = arith.addi %16, %32 : vector<1x256xi32>
    %c16_i32_9 = arith.constant 16 : i32
    %34 = vector.broadcast %c16_i32_9 : i32 to vector<1x256xi32>
    %35 = arith.cmpi slt, %33, %34 : vector<1x256xi32>
    %36 = arith.andi %31, %35 : vector<1x256xi1>
    %37 = arith.extui %36 : vector<1x256xi1> to vector<1x256xi32>
    %38 = arith.sitofp %37 : vector<1x256xi32> to vector<1x256xf32>
    %cst = arith.constant 0.000000e+00 : f32
    %39 = vector.broadcast %cst : f32 to vector<4x128xf32>
    %c0 = arith.constant 0 : index
    %c0_10 = arith.constant 0 : index
    %40 = vector.load %arg6[%c0, %c0_10] : memref<4x512xf32, #tpu.memory_space<vmem>>, vector<4x128xf32>
    tpu.vector_store %arg6[%c0, %c0_10], %39 {strides = array<i32>} : memref<4x512xf32, #tpu.memory_space<vmem>>, vector<4x128xf32>,
    %c0_11 = arith.constant 0 : index
    %c384 = arith.constant 384 : index
    %41 = vector.load %arg6[%c0_11, %c384] : memref<4x512xf32, #tpu.memory_space<vmem>>, vector<4x128xf32>
    tpu.vector_store %arg6[%c0_11, %c384], %39 {strides = array<i32>} : memref<4x512xf32, #tpu.memory_space<vmem>>, vector<4x128xf32>,
    %c0_12 = arith.constant 0 : index
    %c0_13 = arith.constant 0 : index
    %c0_14 = arith.constant 0 : index
    %42 = vector.load %arg1[%c0_12, %c0_13, %c0_14] : memref<1x4x256xf32, #tpu.memory_space<vmem>>, vector<1x4x256xf32>
    %43 = vector.shape_cast %42 : vector<1x4x256xf32> to vector<4x256xf32>
    %c0_15 = arith.constant 0 : index
    %c0_16 = arith.constant 0 : index
    %44 = vector.load %arg2[%c0_15, %c0_16] : memref<4x6xf32, #tpu.memory_space<vmem>>, vector<4x1xf32>
    %c0_17 = arith.constant 0 : index
    %c1 = arith.constant 1 : index
    %45 = vector.load %arg2[%c0_17, %c1] : memref<4x6xf32, #tpu.memory_space<vmem>>, vector<4x1xf32>
    %cst_18 = arith.constant dense<0.000000e+00> : vector<4xf32>
    %46 = vector.multi_reduction <add>, %43, %cst_18 [1] : vector<4x256xf32> to vector<4xf32>
    %47 = vector.shape_cast %46 : vector<4xf32> to vector<4x1xf32>
    %48 = arith.mulf %43, %43 : vector<4x256xf32>
    %cst_19 = arith.constant dense<0.000000e+00> : vector<4xf32>
    %49 = vector.multi_reduction <add>, %48, %cst_19 [1] : vector<4x256xf32> to vector<4xf32>
    %50 = vector.shape_cast %49 : vector<4xf32> to vector<4x1xf32>
    %cst_20 = arith.constant 3.906250e-03 : f32
    %51 = vector.broadcast %cst_20 : f32 to vector<4x1xf32>
    %52 = arith.mulf %47, %51 : vector<4x1xf32>
    %cst_21 = arith.constant 3.906250e-03 : f32
    %53 = vector.broadcast %cst_21 : f32 to vector<4x1xf32>
    %54 = arith.mulf %50, %53 : vector<4x1xf32>
    %55 = arith.mulf %52, %52 : vector<4x1xf32>
    %56 = arith.subf %54, %55 : vector<4x1xf32>
    %cst_22 = arith.constant 0.000000e+00 : f32
    %57 = vector.broadcast %cst_22 : f32 to vector<4x1xf32>
    %58 = arith.maximumf %56, %57 : vector<4x1xf32>
    %cst_23 = arith.constant 9.99999974E-6 : f32
    %59 = vector.broadcast %cst_23 : f32 to vector<4x1xf32>
    %60 = arith.addf %58, %59 : vector<4x1xf32>
    %61 = math.rsqrt %60 : vector<4x1xf32>
    %62 = arith.mulf %61, %44 : vector<4x1xf32>
    %63 = arith.mulf %52, %62 : vector<4x1xf32>
    %64 = arith.subf %45, %63 : vector<4x1xf32>
    %65 = vector.broadcast %62 : vector<4x1xf32> to vector<4x256xf32>
    %66 = arith.mulf %43, %65 : vector<4x256xf32>
    %67 = vector.broadcast %64 : vector<4x1xf32> to vector<4x256xf32>
    %68 = arith.addf %66, %67 : vector<4x256xf32>
    %cst_24 = arith.constant 0.000000e+00 : f32
    %69 = vector.broadcast %cst_24 : f32 to vector<4x256xf32>
    %70 = arith.maximumf %68, %69 : vector<4x256xf32>
    %c0_25 = arith.constant 0 : index
    %c128 = arith.constant 128 : index
    %71 = vector.load %arg6[%c0_25, %c128] : memref<4x512xf32, #tpu.memory_space<vmem>>, vector<4x256xf32>
    tpu.vector_store %arg6[%c0_25, %c128], %70 {strides = array<i32>} : memref<4x512xf32, #tpu.memory_space<vmem>>, vector<4x256xf32>,
    %c0_26 = arith.constant 0 : index
    %c2 = arith.constant 2 : index
    %72 = vector.load %arg2[%c0_26, %c2] : memref<4x6xf32, #tpu.memory_space<vmem>>, vector<4x1xf32>
    %c0_27 = arith.constant 0 : index
    %c0_28 = arith.constant 0 : index
    %73 = vector.load %arg3[%c0_27, %c0_28] : memref<4x36xbf16, #tpu.memory_space<vmem>>, vector<4x36xbf16>
    %c0_29 = arith.constant 0 : index
    %c111 = arith.constant 111 : index
    %74 = vector.load %arg6[%c0_29, %c111] : memref<4x512xf32, #tpu.memory_space<vmem>>, vector<4x256xf32>
    %75 = vector.broadcast %27 : vector<1x256xf32> to vector<4x256xf32>
    %76 = arith.mulf %74, %75 : vector<4x256xf32>
    %77 = arith.truncf %76 : vector<4x256xf32> to vector<4x256xbf16>
    %c0_30 = arith.constant 0 : index
    %c0_31 = arith.constant 0 : index
    %78 = vector.load %arg7[%c0_30, %c0_31] : memref<36x256xbf16, #tpu.memory_space<vmem>>, vector<4x256xbf16>
    tpu.vector_store %arg7[%c0_30, %c0_31], %77 {strides = array<i32>} : memref<36x256xbf16, #tpu.memory_space<vmem>>, vector<4x256xbf16>,
    %c0_32 = arith.constant 0 : index
    %c112 = arith.constant 112 : index
    %79 = vector.load %arg6[%c0_32, %c112] : memref<4x512xf32, #tpu.memory_space<vmem>>, vector<4x256xf32>
    %80 = arith.truncf %79 : vector<4x256xf32> to vector<4x256xbf16>
    %c4 = arith.constant 4 : index
    %c0_33 = arith.constant 0 : index
    %81 = vector.load %arg7[%c4, %c0_33] : memref<36x256xbf16, #tpu.memory_space<vmem>>, vector<4x256xbf16>
    tpu.vector_store %arg7[%c4, %c0_33], %80 {strides = array<i32>} : memref<36x256xbf16, #tpu.memory_space<vmem>>, vector<4x256xbf16>,
    %c0_34 = arith.constant 0 : index
    %c113 = arith.constant 113 : index
    %82 = vector.load %arg6[%c0_34, %c113] : memref<4x512xf32, #tpu.memory_space<vmem>>, vector<4x256xf32>
    %83 = vector.broadcast %38 : vector<1x256xf32> to vector<4x256xf32>
    %84 = arith.mulf %82, %83 : vector<4x256xf32>
    %85 = arith.truncf %84 : vector<4x256xf32> to vector<4x256xbf16>
    %c8 = arith.constant 8 : index
    %c0_35 = arith.constant 0 : index
    %86 = vector.load %arg7[%c8, %c0_35] : memref<36x256xbf16, #tpu.memory_space<vmem>>, vector<4x256xbf16>
    tpu.vector_store %arg7[%c8, %c0_35], %85 {strides = array<i32>} : memref<36x256xbf16, #tpu.memory_space<vmem>>, vector<4x256xbf16>,
    %c0_36 = arith.constant 0 : index
    %c127 = arith.constant 127 : index
    %87 = vector.load %arg6[%c0_36, %c127] : memref<4x512xf32, #tpu.memory_space<vmem>>, vector<4x256xf32>
    %88 = vector.broadcast %27 : vector<1x256xf32> to vector<4x256xf32>
    %89 = arith.mulf %87, %88 : vector<4x256xf32>
    %90 = arith.truncf %89 : vector<4x256xf32> to vector<4x256xbf16>
    %c12 = arith.constant 12 : index
    %c0_37 = arith.constant 0 : index
    %91 = vector.load %arg7[%c12, %c0_37] : memref<36x256xbf16, #tpu.memory_space<vmem>>, vector<4x256xbf16>
    tpu.vector_store %arg7[%c12, %c0_37], %90 {strides = array<i32>} : memref<36x256xbf16, #tpu.memory_space<vmem>>, vector<4x256xbf16>,
    %c0_38 = arith.constant 0 : index
    %c128_39 = arith.constant 128 : index
    %92 = vector.load %arg6[%c0_38, %c128_39] : memref<4x512xf32, #tpu.memory_space<vmem>>, vector<4x256xf32>
    %93 = arith.truncf %92 : vector<4x256xf32> to vector<4x256xbf16>
    %c16 = arith.constant 16 : index
    %c0_40 = arith.constant 0 : index
    %94 = vector.load %arg7[%c16, %c0_40] : memref<36x256xbf16, #tpu.memory_space<vmem>>, vector<4x256xbf16>
    tpu.vector_store %arg7[%c16, %c0_40], %93 {strides = array<i32>} : memref<36x256xbf16, #tpu.memory_space<vmem>>, vector<4x256xbf16>,
    %c0_41 = arith.constant 0 : index
    %c129 = arith.constant 129 : index
    %95 = vector.load %arg6[%c0_41, %c129] : memref<4x512xf32, #tpu.memory_space<vmem>>, vector<4x256xf32>
    %96 = vector.broadcast %38 : vector<1x256xf32> to vector<4x256xf32>
    %97 = arith.mulf %95, %96 : vector<4x256xf32>
    %98 = arith.truncf %97 : vector<4x256xf32> to vector<4x256xbf16>
    %c20 = arith.constant 20 : index
    %c0_42 = arith.constant 0 : index
    %99 = vector.load %arg7[%c20, %c0_42] : memref<36x256xbf16, #tpu.memory_space<vmem>>, vector<4x256xbf16>
    tpu.vector_store %arg7[%c20, %c0_42], %98 {strides = array<i32>} : memref<36x256xbf16, #tpu.memory_space<vmem>>, vector<4x256xbf16>,
    %c0_43 = arith.constant 0 : index
    %c143 = arith.constant 143 : index
    %100 = vector.load %arg6[%c0_43, %c143] : memref<4x512xf32, #tpu.memory_space<vmem>>, vector<4x256xf32>
    %101 = vector.broadcast %27 : vector<1x256xf32> to vector<4x256xf32>
    %102 = arith.mulf %100, %101 : vector<4x256xf32>
    %103 = arith.truncf %102 : vector<4x256xf32> to vector<4x256xbf16>
    %c24 = arith.constant 24 : index
    %c0_44 = arith.constant 0 : index
    %104 = vector.load %arg7[%c24, %c0_44] : memref<36x256xbf16, #tpu.memory_space<vmem>>, vector<4x256xbf16>
    tpu.vector_store %arg7[%c24, %c0_44], %103 {strides = array<i32>} : memref<36x256xbf16, #tpu.memory_space<vmem>>, vector<4x256xbf16>,
    %c0_45 = arith.constant 0 : index
    %c144 = arith.constant 144 : index
    %105 = vector.load %arg6[%c0_45, %c144] : memref<4x512xf32, #tpu.memory_space<vmem>>, vector<4x256xf32>
    %106 = arith.truncf %105 : vector<4x256xf32> to vector<4x256xbf16>
    %c28 = arith.constant 28 : index
    %c0_46 = arith.constant 0 : index
    %107 = vector.load %arg7[%c28, %c0_46] : memref<36x256xbf16, #tpu.memory_space<vmem>>, vector<4x256xbf16>
    tpu.vector_store %arg7[%c28, %c0_46], %106 {strides = array<i32>} : memref<36x256xbf16, #tpu.memory_space<vmem>>, vector<4x256xbf16>,
    %c0_47 = arith.constant 0 : index
    %c145 = arith.constant 145 : index
    %108 = vector.load %arg6[%c0_47, %c145] : memref<4x512xf32, #tpu.memory_space<vmem>>, vector<4x256xf32>
    %109 = vector.broadcast %38 : vector<1x256xf32> to vector<4x256xf32>
    %110 = arith.mulf %108, %109 : vector<4x256xf32>
    %111 = arith.truncf %110 : vector<4x256xf32> to vector<4x256xbf16>
    %c32 = arith.constant 32 : index
    %c0_48 = arith.constant 0 : index
    %112 = vector.load %arg7[%c32, %c0_48] : memref<36x256xbf16, #tpu.memory_space<vmem>>, vector<4x256xbf16>
    tpu.vector_store %arg7[%c32, %c0_48], %111 {strides = array<i32>} : memref<36x256xbf16, #tpu.memory_space<vmem>>, vector<4x256xbf16>,
    %c0_49 = arith.constant 0 : index
    %c0_50 = arith.constant 0 : index
    %113 = vector.load %arg7[%c0_49, %c0_50] : memref<36x256xbf16, #tpu.memory_space<vmem>>, vector<36x256xbf16>
    %cst_51 = arith.constant dense<0.000000e+00> : vector<4x256xf32>
    %114 = tpu.matmul %73, %113, %cst_51 {dimension_numbers = #tpu.dot_dimension_numbers<[1], [0], [0], [1], [0, 0, 1, 1], [], []>} : vector<4x36xbf16>, vector<36x256xbf16>, vector<4x256xf32> -> vector<4x256xf32>
    %115 = vector.broadcast %72 : vector<4x1xf32> to vector<4x256xf32>
    %116 = arith.addf %114, %115 : vector<4x256xf32>
    %c0_52 = arith.constant 0 : index
    %c3 = arith.constant 3 : index
    %117 = vector.load %arg2[%c0_52, %c3] : memref<4x6xf32, #tpu.memory_space<vmem>>, vector<4x1xf32>
    %c0_53 = arith.constant 0 : index
    %c4_54 = arith.constant 4 : index
    %118 = vector.load %arg2[%c0_53, %c4_54] : memref<4x6xf32, #tpu.memory_space<vmem>>, vector<4x1xf32>
    %cst_55 = arith.constant dense<0.000000e+00> : vector<4xf32>
    %119 = vector.multi_reduction <add>, %116, %cst_55 [1] : vector<4x256xf32> to vector<4xf32>
    %120 = vector.shape_cast %119 : vector<4xf32> to vector<4x1xf32>
    %121 = arith.mulf %116, %116 : vector<4x256xf32>
    %cst_56 = arith.constant dense<0.000000e+00> : vector<4xf32>
    %122 = vector.multi_reduction <add>, %121, %cst_56 [1] : vector<4x256xf32> to vector<4xf32>
    %123 = vector.shape_cast %122 : vector<4xf32> to vector<4x1xf32>
    %cst_57 = arith.constant 3.906250e-03 : f32
    %124 = vector.broadcast %cst_57 : f32 to vector<4x1xf32>
    %125 = arith.mulf %120, %124 : vector<4x1xf32>
    %cst_58 = arith.constant 3.906250e-03 : f32
    %126 = vector.broadcast %cst_58 : f32 to vector<4x1xf32>
    %127 = arith.mulf %123, %126 : vector<4x1xf32>
    %128 = arith.mulf %125, %125 : vector<4x1xf32>
    %129 = arith.subf %127, %128 : vector<4x1xf32>
    %cst_59 = arith.constant 0.000000e+00 : f32
    %130 = vector.broadcast %cst_59 : f32 to vector<4x1xf32>
    %131 = arith.maximumf %129, %130 : vector<4x1xf32>
    %cst_60 = arith.constant 9.99999974E-6 : f32
    %132 = vector.broadcast %cst_60 : f32 to vector<4x1xf32>
    %133 = arith.addf %131, %132 : vector<4x1xf32>
    %134 = math.rsqrt %133 : vector<4x1xf32>
    %135 = arith.mulf %134, %117 : vector<4x1xf32>
    %136 = arith.mulf %125, %135 : vector<4x1xf32>
    %137 = arith.subf %118, %136 : vector<4x1xf32>
    %138 = vector.broadcast %135 : vector<4x1xf32> to vector<4x256xf32>
    %139 = arith.mulf %116, %138 : vector<4x256xf32>
    %140 = vector.broadcast %137 : vector<4x1xf32> to vector<4x256xf32>
    %141 = arith.addf %139, %140 : vector<4x256xf32>
    %cst_61 = arith.constant 0.000000e+00 : f32
    %142 = vector.broadcast %cst_61 : f32 to vector<4x256xf32>
    %143 = arith.maximumf %141, %142 : vector<4x256xf32>
    %c0_62 = arith.constant 0 : index
    %c128_63 = arith.constant 128 : index
    %144 = vector.load %arg6[%c0_62, %c128_63] : memref<4x512xf32, #tpu.memory_space<vmem>>, vector<4x256xf32>
    tpu.vector_store %arg6[%c0_62, %c128_63], %143 {strides = array<i32>} : memref<4x512xf32, #tpu.memory_space<vmem>>, vector<4x256xf32>,
    %c0_64 = arith.constant 0 : index
    %c5 = arith.constant 5 : index
    %145 = vector.load %arg2[%c0_64, %c5] : memref<4x6xf32, #tpu.memory_space<vmem>>, vector<4x1xf32>
    %c0_65 = arith.constant 0 : index
    %c0_66 = arith.constant 0 : index
    %146 = vector.load %arg4[%c0_65, %c0_66] : memref<4x36xbf16, #tpu.memory_space<vmem>>, vector<4x36xbf16>
    %c0_67 = arith.constant 0 : index
    %c111_68 = arith.constant 111 : index
    %147 = vector.load %arg6[%c0_67, %c111_68] : memref<4x512xf32, #tpu.memory_space<vmem>>, vector<4x256xf32>
    %148 = vector.broadcast %27 : vector<1x256xf32> to vector<4x256xf32>
    %149 = arith.mulf %147, %148 : vector<4x256xf32>
    %150 = arith.truncf %149 : vector<4x256xf32> to vector<4x256xbf16>
    %c0_69 = arith.constant 0 : index
    %c0_70 = arith.constant 0 : index
    %151 = vector.load %arg7[%c0_69, %c0_70] : memref<36x256xbf16, #tpu.memory_space<vmem>>, vector<4x256xbf16>
    tpu.vector_store %arg7[%c0_69, %c0_70], %150 {strides = array<i32>} : memref<36x256xbf16, #tpu.memory_space<vmem>>, vector<4x256xbf16>,
    %c0_71 = arith.constant 0 : index
    %c112_72 = arith.constant 112 : index
    %152 = vector.load %arg6[%c0_71, %c112_72] : memref<4x512xf32, #tpu.memory_space<vmem>>, vector<4x256xf32>
    %153 = arith.truncf %152 : vector<4x256xf32> to vector<4x256xbf16>
    %c4_73 = arith.constant 4 : index
    %c0_74 = arith.constant 0 : index
    %154 = vector.load %arg7[%c4_73, %c0_74] : memref<36x256xbf16, #tpu.memory_space<vmem>>, vector<4x256xbf16>
    tpu.vector_store %arg7[%c4_73, %c0_74], %153 {strides = array<i32>} : memref<36x256xbf16, #tpu.memory_space<vmem>>, vector<4x256xbf16>,
    %c0_75 = arith.constant 0 : index
    %c113_76 = arith.constant 113 : index
    %155 = vector.load %arg6[%c0_75, %c113_76] : memref<4x512xf32, #tpu.memory_space<vmem>>, vector<4x256xf32>
    %156 = vector.broadcast %38 : vector<1x256xf32> to vector<4x256xf32>
    %157 = arith.mulf %155, %156 : vector<4x256xf32>
    %158 = arith.truncf %157 : vector<4x256xf32> to vector<4x256xbf16>
    %c8_77 = arith.constant 8 : index
    %c0_78 = arith.constant 0 : index
    %159 = vector.load %arg7[%c8_77, %c0_78] : memref<36x256xbf16, #tpu.memory_space<vmem>>, vector<4x256xbf16>
    tpu.vector_store %arg7[%c8_77, %c0_78], %158 {strides = array<i32>} : memref<36x256xbf16, #tpu.memory_space<vmem>>, vector<4x256xbf16>,
    %c0_79 = arith.constant 0 : index
    %c127_80 = arith.constant 127 : index
    %160 = vector.load %arg6[%c0_79, %c127_80] : memref<4x512xf32, #tpu.memory_space<vmem>>, vector<4x256xf32>
    %161 = vector.broadcast %27 : vector<1x256xf32> to vector<4x256xf32>
    %162 = arith.mulf %160, %161 : vector<4x256xf32>
    %163 = arith.truncf %162 : vector<4x256xf32> to vector<4x256xbf16>
    %c12_81 = arith.constant 12 : index
    %c0_82 = arith.constant 0 : index
    %164 = vector.load %arg7[%c12_81, %c0_82] : memref<36x256xbf16, #tpu.memory_space<vmem>>, vector<4x256xbf16>
    tpu.vector_store %arg7[%c12_81, %c0_82], %163 {strides = array<i32>} : memref<36x256xbf16, #tpu.memory_space<vmem>>, vector<4x256xbf16>,
    %c0_83 = arith.constant 0 : index
    %c128_84 = arith.constant 128 : index
    %165 = vector.load %arg6[%c0_83, %c128_84] : memref<4x512xf32, #tpu.memory_space<vmem>>, vector<4x256xf32>
    %166 = arith.truncf %165 : vector<4x256xf32> to vector<4x256xbf16>
    %c16_85 = arith.constant 16 : index
    %c0_86 = arith.constant 0 : index
    %167 = vector.load %arg7[%c16_85, %c0_86] : memref<36x256xbf16, #tpu.memory_space<vmem>>, vector<4x256xbf16>
    tpu.vector_store %arg7[%c16_85, %c0_86], %166 {strides = array<i32>} : memref<36x256xbf16, #tpu.memory_space<vmem>>, vector<4x256xbf16>,
    %c0_87 = arith.constant 0 : index
    %c129_88 = arith.constant 129 : index
    %168 = vector.load %arg6[%c0_87, %c129_88] : memref<4x512xf32, #tpu.memory_space<vmem>>, vector<4x256xf32>
    %169 = vector.broadcast %38 : vector<1x256xf32> to vector<4x256xf32>
    %170 = arith.mulf %168, %169 : vector<4x256xf32>
    %171 = arith.truncf %170 : vector<4x256xf32> to vector<4x256xbf16>
    %c20_89 = arith.constant 20 : index
    %c0_90 = arith.constant 0 : index
    %172 = vector.load %arg7[%c20_89, %c0_90] : memref<36x256xbf16, #tpu.memory_space<vmem>>, vector<4x256xbf16>
    tpu.vector_store %arg7[%c20_89, %c0_90], %171 {strides = array<i32>} : memref<36x256xbf16, #tpu.memory_space<vmem>>, vector<4x256xbf16>,
    %c0_91 = arith.constant 0 : index
    %c143_92 = arith.constant 143 : index
    %173 = vector.load %arg6[%c0_91, %c143_92] : memref<4x512xf32, #tpu.memory_space<vmem>>, vector<4x256xf32>
    %174 = vector.broadcast %27 : vector<1x256xf32> to vector<4x256xf32>
    %175 = arith.mulf %173, %174 : vector<4x256xf32>
    %176 = arith.truncf %175 : vector<4x256xf32> to vector<4x256xbf16>
    %c24_93 = arith.constant 24 : index
    %c0_94 = arith.constant 0 : index
    %177 = vector.load %arg7[%c24_93, %c0_94] : memref<36x256xbf16, #tpu.memory_space<vmem>>, vector<4x256xbf16>
    tpu.vector_store %arg7[%c24_93, %c0_94], %176 {strides = array<i32>} : memref<36x256xbf16, #tpu.memory_space<vmem>>, vector<4x256xbf16>,
    %c0_95 = arith.constant 0 : index
    %c144_96 = arith.constant 144 : index
    %178 = vector.load %arg6[%c0_95, %c144_96] : memref<4x512xf32, #tpu.memory_space<vmem>>, vector<4x256xf32>
    %179 = arith.truncf %178 : vector<4x256xf32> to vector<4x256xbf16>
    %c28_97 = arith.constant 28 : index
    %c0_98 = arith.constant 0 : index
    %180 = vector.load %arg7[%c28_97, %c0_98] : memref<36x256xbf16, #tpu.memory_space<vmem>>, vector<4x256xbf16>
    tpu.vector_store %arg7[%c28_97, %c0_98], %179 {strides = array<i32>} : memref<36x256xbf16, #tpu.memory_space<vmem>>, vector<4x256xbf16>,
    %c0_99 = arith.constant 0 : index
    %c145_100 = arith.constant 145 : index
    %181 = vector.load %arg6[%c0_99, %c145_100] : memref<4x512xf32, #tpu.memory_space<vmem>>, vector<4x256xf32>
    %182 = vector.broadcast %38 : vector<1x256xf32> to vector<4x256xf32>
    %183 = arith.mulf %181, %182 : vector<4x256xf32>
    %184 = arith.truncf %183 : vector<4x256xf32> to vector<4x256xbf16>
    %c32_101 = arith.constant 32 : index
    %c0_102 = arith.constant 0 : index
    %185 = vector.load %arg7[%c32_101, %c0_102] : memref<36x256xbf16, #tpu.memory_space<vmem>>, vector<4x256xbf16>
    tpu.vector_store %arg7[%c32_101, %c0_102], %184 {strides = array<i32>} : memref<36x256xbf16, #tpu.memory_space<vmem>>, vector<4x256xbf16>,
    %c0_103 = arith.constant 0 : index
    %c0_104 = arith.constant 0 : index
    %186 = vector.load %arg7[%c0_103, %c0_104] : memref<36x256xbf16, #tpu.memory_space<vmem>>, vector<36x256xbf16>
    %cst_105 = arith.constant dense<0.000000e+00> : vector<4x256xf32>
    %187 = tpu.matmul %146, %186, %cst_105 {dimension_numbers = #tpu.dot_dimension_numbers<[1], [0], [0], [1], [0, 0, 1, 1], [], []>} : vector<4x36xbf16>, vector<36x256xbf16>, vector<4x256xf32> -> vector<4x256xf32>
    %188 = vector.broadcast %145 : vector<4x1xf32> to vector<4x256xf32>
    %189 = arith.addf %187, %188 : vector<4x256xf32>
    %c0_106 = arith.constant 0 : index
    %c0_107 = arith.constant 0 : index
    %c0_108 = arith.constant 0 : index
    %190 = vector.load %arg1[%c0_106, %c0_107, %c0_108] : memref<1x4x256xf32, #tpu.memory_space<vmem>>, vector<1x4x256xf32>
    %191 = vector.shape_cast %190 : vector<1x4x256xf32> to vector<4x256xf32>
    %192 = arith.addf %189, %191 : vector<4x256xf32>
    %c0_109 = arith.constant 0 : index
    %c0_110 = arith.constant 0 : index
    %c0_111 = arith.constant 0 : index
    %193 = vector.load %arg5[%c0_109, %c0_110, %c0_111] : memref<1x4x256xf32, #tpu.memory_space<vmem>>, vector<1x4x256xf32>
    %194 = vector.shape_cast %193 : vector<1x4x256xf32> to vector<4x256xf32>
    %195 = vector.shape_cast %192 : vector<4x256xf32> to vector<1x4x256xf32>
    tpu.vector_store %arg5[%c0_109, %c0_110, %c0_111], %195 {strides = array<i32>} : memref<1x4x256xf32, #tpu.memory_space<vmem>>, vector<1x4x256xf32>,
    return
  }
  func.func @transform_0(%arg0: i32) -> (i32, i32, i32) {
    %c0_i32 = arith.constant 0 : i32
    %c0_i32_0 = arith.constant 0 : i32
    %c0_i32_1 = arith.constant 0 : i32
    return %arg0, %c0_i32, %c0_i32_0 : i32, i32, i32
  }
  func.func @transform_1(%arg0: i32) -> (i32, i32) {
    %c0_i32 = arith.constant 0 : i32
    %c0_i32_0 = arith.constant 0 : i32
    %c0_i32_1 = arith.constant 0 : i32
    return %c0_i32, %c0_i32_0 : i32, i32
  }
  func.func @transform_2(%arg0: i32) -> (i32, i32) {
    %c0_i32 = arith.constant 0 : i32
    %c0_i32_0 = arith.constant 0 : i32
    %c0_i32_1 = arith.constant 0 : i32
    return %c0_i32, %c0_i32_0 : i32, i32
  }
  func.func @transform_3(%arg0: i32) -> (i32, i32) {
    %c0_i32 = arith.constant 0 : i32
    %c0_i32_0 = arith.constant 0 : i32
    %c0_i32_1 = arith.constant 0 : i32
    return %c0_i32, %c0_i32_0 : i32, i32
  }
  func.func @transform_4(%arg0: i32) -> (i32, i32, i32) {
    %c0_i32 = arith.constant 0 : i32
    %c0_i32_0 = arith.constant 0 : i32
    %c0_i32_1 = arith.constant 0 : i32
    return %arg0, %c0_i32, %c0_i32_0 : i32, i32, i32
  }
}

</mosaic_0001>

<bundles_post_ra>
// kernel: tpu_custom_call.1
= control target key start
LH: loop header
LB: loop body
LE: loop exit
PB: predicated region body
PF: predicated region fallthrough
CT: control target
= control target key end

     0   :  { %9 = vsyncpa [#allocation5], 0  ;;  %s1977_s0 = inlined_call_operand.hbm [shape: f32[2,4,256], index: 0, kind: input, shape index: {}]   ;;  %s1978_s1 = inlined_call_operand.hbm [shape: f32[4,6], index: 1, kind: input, shape index: {}]   ;;  %s1979_s2 = inlined_call_operand.hbm [shape: bf16[4,36], index: 2, kind: input, shape index: {}]   ;;  %s1980_s3 = inlined_call_operand.vmem [shape: bf16[4,36], index: 3, kind: input, shape index: {}]   ;;  %s1981_s4 = inlined_call_operand.hbm [shape: f32[2,4,256], index: 4, kind: output, shape index: {}]  }
   0x1   :  { %11 = vsyncpa [#allocation5 + $0x1], 0 }
   0x2   :  { %12 = vsyncpa [#allocation8], 0 }
   0x3   :  { %13 = vsyncpa [#allocation6], 0 }
   0x4   :  { %15 = vsyncpa [#allocation6 + $0x1], 0  ;;  %s1611_s15 = smov 0   ;;  %s1613_s16 = smov 0  }
   0x5   :  { %s1615_s17 = smov 0   ;;  %s1617_s18 = smov 0  }
   0x6 LB: > { %s1632_s19 = sadd.s32 4294967295, %s1566_s18   ;;  %s1244_s20 = sadd.s32 4294967294, %s1566_s18   ;;  %s1566_s18 = sphi %s1617_s18, %s1991_s18   ;;  %s1562_s17 = sphi %s1615_s17, %s1990_s17   ;;  %s1558_s16 = sphi %s1613_s16, %s1989_s16   ;;  %s1554_s15 = sphi %s1611_s15, %s1988_s15  }
   0x7   : > { %p41_p0 = scmp.ne.s32.totalorder %s1558_s16, %s1554_s15  ;;  %p42_p1 = scmp.eq.s32.totalorder %s1632_s19, 0 }
   0x8   : > { %p128_p2 = scmp.eq.s32.totalorder %s1632_s19, 1  ;;  %p134_p3 = scmp.eq.s32.totalorder %s1244_s20, 1 }
   0x9   : > { %p1641_p4 = por %p42_p1, %p41_p0  ;;  %p1245_p5 = scmp.ge.s32.totalorder %s1566_s18, 1 }
   0xa   : > { %p1646_p6 = por %p134_p3, %p41_p0  ;;  %p141_p7 = scmp.lt.s32.totalorder %s1566_s18, 3 }
   0xb   : > { %s153_s25 = sshll.u32 %s1978_s1, 4  ;;  %s1568_s27 = smov [#allocation7]   ;;  %s154_s25 = int_to_ptr.hbm [resolvable:$true] %s153_s25 }
   0xc   : > { %p1654_p8 = pnand %p1245_p5, %p141_p7  ;;  %s155_s28 = sshll.u32 %s1568_s27, 4  ;;  %s156_s28 = int_to_ptr.vmem [resolvable:$true] %s155_s28 }
   0xd   : > { %s165_s5 = sshll.u32 %s1979_s2, 4  ;;  %s1569_s6 = smov [#allocation9]   ;;  %s166_s5 = int_to_ptr.hbm [resolvable:$true] %s165_s5 }
   0xe   : > { %p1324_p10 = pneg %p1654_p8  ;;  %s167_s7 = sshll.u32 %s1569_s6, 4  ;;  %s168_s7 = int_to_ptr.vmem [resolvable:$true] %s167_s7 }
   0xf   : > { %s1667_s8 = sadd.s32 1, %s1566_s18   ;;  %s28_s9 = sadd.s32 1, %s1562_s17 }
  0x10   : > { %p1325_p11 = pnand %p1324_p10, %p42_p1  ;;  %s25_s10 = ssub.s32 %s1566_s18, %s1667_s8 }
  0x11   : > { %p35_p12 = scmp.ne.s32.totalorder %s1562_s17, %s1558_s16  ;;  %p26_p13 = scmp.eq.s32.totalorder %s25_s10, 0 }
  0x12   : > { %1327 = dma.hbm_to_vmem [thread:$0]  (!%p1325_p11), %s154_s25, 64, %s156_s28, [#allocation8]  }
  0x13   : > { %1330 = dma.hbm_to_vmem [thread:$0]  (!%p1325_p11), %s166_s5, 32, %s168_s7, [#allocation8]  }
  0x14   : > { %p36_p0 = scmp.eq.s32.totalorder %s1566_s18, 0  ;;  %p1677_p3 = por %p128_p2, %p35_p12 }
  0x15   : > { %p1341_p5 = scmp.lt.s32.totalorder %s1566_s18, 2  ;;  %s181_s13 = sand.u32 1, %s1562_s17  }
  0x16   : > { %s1683_s12 = scalar_select %p26_p13, %s1562_s17, %s28_s9  }
  0x17   : > { %p37_p7 = por %p36_p0, %p35_p12  ;;  %s1249_s14 = sshll.u32 %s181_s13, 3 }
  0x18   : > { %s1302_s20 = sshll.u32 %s1566_s18, 3  ;;  %s185_s27 = scalar_lea.vmem [#allocation4], %s1249_s14 }
  0x19   : > { %s190_s25 = scalar_lea.hbm %s1977_s0, %s1302_s20  ;;  %s194_s28 = sshll.u32 %s185_s27, 4  ;;  %s195_s28 = int_to_ptr.vmem [resolvable:$true] %s194_s28 }
  0x1a   : > { %s192_s29 = sshll.u32 %s190_s25, 4  ;;  %p1690_p2 = pnand %p1341_p5, %p37_p7  ;;  %s193_s29 = int_to_ptr.hbm [resolvable:$true] %s192_s29 }
  0x1b   : > { %s182_s5 = scalar_lea.sflag [#allocation5], %s181_s13  ;;  %s1466_s6 = sshra.s32 %s193_s29, 4  ;;  %s1467_s6 = int_to_ptr.hbm [resolvable:$true] %s1466_s6 }
  0x1c   : > { %s1468_s7 = scalar_lea.hbm %s1467_s6, 8  ;;  %p1470_p11 = pneg %p1690_p2 }
  0x1d   : > { %p1469_p10 = scmp.ne.s32.totalorder %s1467_s6, %s1468_s7  ;;  %s1473_s14 = scalar_lea.hbm %s1977_s0, 16 }
  0x1e   : > { %p1474_p0 = scmp.lt.s32.totalorder %s1467_s6, %s1977_s0  ;;  %p1475_p5 = scmp.lt.s32.totalorder %s1473_s14, %s1468_s7 }
  0x1f   : > { %p1471_p12 = pnand %p1470_p11, %p1469_p10 }
  0x20   : > { %p1476_p7 = por %p1475_p5, %p1474_p0 }
  0x21   : > { %p1472_p13 = pneg %p1471_p12 }
  0x23   : > { %p1477_p9 = pnand %p1476_p7, %p1472_p13 }
  0x25   : > { %1480 = shalt.err (!%p1477_p9)
}
  0x26   : > { %1334 = dma.hbm_to_vmem [thread:$0]  (!%p1690_p2), %s193_s29, 128, %s195_s28, %s182_s5  }
  0x27   : > { %203 = sbr.rel (%p1654_p8) target bundleno = 1492 (0x5d4), region = 36  ;;  %s1707_s13 = sand.u32 (!%p1654_p8), 1, %s1558_s16  }
  0x28   : > { %s1253_s24 = sshll.u32 (!%p1654_p8), %s1707_s13, 3  ;;  %s206_s25 = scalar_lea.sflag (!%p1654_p8), [#allocation5], %s1707_s13 }
  0x29   : > { %s1713_s27 = scalar_lea.vmem (!%p1654_p8), [#allocation4], %s1253_s24 }
  0x2c   : > { %1541 = dma.done.wait (%p1641_p4), %s206_s25, 128  }
  0x2d   : > { %1543 = vsyncadd (%p1641_p4), %s206_s25, 4294967168 }
  0x2e   : > { %1545 = dma.done.wait (%p42_p1), [#allocation8], 96  }
  0x2f   : > { %1547 = vsyncadd (%p42_p1), [#allocation8], 4294967200  ;;  %v1724_v0 = vld [vmem:[%s1713_s27] sm:$0xff]  ;;  %vm307_vm0 = vcmask 1043456   ;;  %v1570_v15 = vmov 0   ;;  %v246_v21 = vlaneseq  ;;  %v1571_v22 = vmov 0.0  }
  0x30   : > { %302 = vst [vmem:[#allocation1] ss:$2 sm:$0xff] %v1724_v0  ;;  %v313_v1 = vmul.f32 %v1724_v0, %v1724_v0  ;;  %1395 = vset.pattern.permute.xlu1 %v1570_v15  ;;  %s1572_s21 = smov 113   ;;  %v300_v38 = vld [vmem:[#allocation7] sm:$0xf]  ;;  %s1573_s26 = smov 1  }
  0x31   : > { %297 = vst [vmem:[#allocation2] sm:$0xf] %v1571_v22  ;;  %v247_v23 = vand.u32 127, %v246_v21  ;;  %s1574_s28 = smov 127   ;;  %s1575_s29 = smov 15   ;;  %v1576_v49 = vmov 1  }
  0x32   : > { %298 = vst [vmem:[#allocation2 + $0xc] sm:$0xf] %v1571_v22  ;;  %1396 = vset.pattern.permute.xlu2 %v1576_v49  ;;  %s1577_s30 = smov 111   ;;  %s1578_s5 = smov 17   ;;  %v1579_v52 = vmov 839922192  }
  0x33   : > { %v248_v24 = vadd.s32 128, %v247_v23  ;;  %v253_v25 = vand.u32 15, %v247_v23  ;;  %v353_v53 = vunpack.c.l.s4 %v1579_v52  ;;  %vm381_vm8 = vcmask 908288   ;;  %s1580_s6 = smov 112   ;;  %s1581_s7 = smov 16  }
  0x34   : > { %vm453_vm9 = vcmask 924672   ;;  %vm490_vm10 = vcmask 1039360   ;;  %vm520_vm11 = vcmask 7168   ;;  %vm481_vm12 = vcmask 121856   ;;  %s1311_s14 = sshll.u32 %s1632_s19, 3  ;;  %s1139_s19 = scalar_lea.sflag [#allocation6], %s1707_s13 }
  0x35   : > { %v260_v26 = vand.u32 15, %v248_v24  ;;  %v285_v28 = vadd.s32 1, %v253_v25  ;;  %v273_v44 = vadd.s32 4294967295, %v253_v25  ;;  %v354_v54 = vunpack.c.0.s8 %v353_v53  ;;  %s1150_s25 = scalar_lea.hbm %s1981_s4, %s1311_s14 }
  0x36   : > { %vm410_vm13 = vcmask 138240   ;;  %vm440_vm14 = vcmask 130048   ;;  %vm635_vm15 = vcmask 916480  }
  0x37   : > { %v303_v2 = vld.sshfl [vmem:[#allocation1] sm:$0xff pattern:$0x75316420]  ;;  %v304_v3 = vld.sshfl [vmem:[#allocation1 + $0x8] sm:$0xff pattern:$0x75316420] }
  0x38   : > { %v308_v4 = vsel %vm307_vm0, %v303_v2, 0.0  ;;  %v309_v5 = vsel %vm307_vm0, %v304_v3, 0.0  ;;  %315 = vst [vmem:[#allocation1] ss:$2 sm:$0xff] %v313_v1  ;;  %v286_v29 = vadd.s32 1, %v260_v26  ;;  %vm289_vm1 = vcmp.lt.s32.totalorder %v285_v28, 16 }
  0x39   : > { %v310_v6 = vadd.f32 %v309_v5, %v308_v4  ;;  %v1259_v32 = vsel %vm289_vm1, 1.0, %v1571_v22  ;;  %v274_v43 = vadd.s32 4294967295, %v260_v26  ;;  %vm275_vm7 = vcmp.ge.s32.totalorder %v273_v44, 0  ;;  %v610_v49 = vld [vmem:[#allocation2 + $0xc] sm:$0xf] }
  0x3a   : > { %vm290_vm2 = vcmp.lt.s32.totalorder %v286_v29, 16  ;;  %v1257_v47 = vsel %vm275_vm7, 1.0, %v1571_v22  ;;  %vm715_vm1 = vcmask 1041408  }
  0x3b   : > { %311 = vadd.xlane.f32.xlu0 %v310_v6  ;;  %v1260_v33 = vsel %vm290_vm2, 1.0, %v1571_v22  ;;  %vm276_vm6 = vcmp.ge.s32.totalorder %v274_v43, 0  ;;  %vm711_vm2 = vcmask 293888  }
  0x3c   : > { %v448_v34 = vrot.slane %v1260_v33, 4  ;;  %v1258_v45 = vsel %vm276_vm6, 1.0, %v1571_v22 }
  0x3d   : > { %v376_v46 = vrot.slane %v1258_v45, 4 }
  0x3e   : > { %v449_v36 = vsel %vm307_vm0, %v1259_v32, %v448_v34 }
  0x3f   : > { %v316_v7 = vld.sshfl [vmem:[#allocation1] sm:$0xff pattern:$0x75316420]  ;;  %v317_v8 = vld.sshfl [vmem:[#allocation1 + $0x8] sm:$0xff pattern:$0x75316420]  ;;  %v377_v48 = vsel %vm307_vm0, %v1257_v47, %v376_v46 }
  0x40   : > { %v320_v9 = vsel %vm307_vm0, %v316_v7, 0.0  ;;  %v321_v10 = vsel %vm307_vm0, %v317_v8, 0.0 }
  0x41   : > { %v322_v11 = vadd.f32 %v321_v10, %v320_v9 }
  0x43   : > { %323 = vadd.xlane.f32.xlu0 %v322_v11 }
  0x57   : > { %450 = vrot.lane.b32.xlu0 %v449_v36, %s1572_s21 }
  0xae   : > { %v312_v12 = vpop.xlane.xlu0 %311 }
  0xaf   : > { %v325_v13 = vmul.f32 0.00390625, %v312_v12 }
  0xb1   : > { %v327_v16 = vmul.f32 %v325_v13, %v325_v13 }
  0xb6   : > { %v324_v14 = vpop.xlane.xlu0 %323 }
  0xb7   : > { %v326_v17 = vmul.f32 0.00390625, %v324_v14 }
  0xb9   : > { %v328_v18 = vsub.f32 %v326_v17, %v327_v16 }
  0xbb   : > { %v329_v19 = vmax.f32 %v328_v18, 0.0 }
  0xbd   : > { %v330_v20 = vadd.f32 1e-05, %v329_v19 }
  0xbf   : > { %1402 = vrsqrt.f32 %v330_v20  ;;  %vm337_vm4 = vweird.f32 %v330_v20 }
  0xc5   : > { %v1403_v27 = vpop.eup %1402 }
  0xc6   : > { %v332_v30 = vmul.f32 %v1403_v27, %v330_v20  ;;  %vm338_vm3 = vweird.f32 %v1403_v27 }
  0xc7   : > { %vm339_vm5 = vmor %vm337_vm4, %vm338_vm3 }
  0xc8   : > { %v333_v31 = vmul.f32 %v1403_v27, %v332_v30  ;;  %v534_v30 = vld [vmem:[#allocation2 + $0xc] sm:$0xf] }
  0xc9   : > { %v451_v5 = vpop.permute.xlu0 %450 }
  0xca   : > { %v334_v35 = vmul.f32 0.5, %v333_v31  ;;  %v1754_v7 = vrot.slane %v451_v5, 4 }
  0xcc   : > { %v335_v37 = vsub.f32 1.5, %v334_v35 }
  0xce   : > { %v336_v39 = vmul.f32 %v1403_v27, %v335_v37  ;;  %v573_v37 = vld [vmem:[#allocation2 + $0xc] sm:$0xf] }
  0xd0   : > { %v340_v40 = vsel %vm339_vm5, %v1403_v27, %v336_v39 }
  0xd1   : > { %v341_v41 = vmul.f32 %v340_v40, %v300_v38 }
  0xd3   : > { %v342_v42 = vmul.f32 %v341_v41, %v325_v13  ;;  %v1759_v13 = vsel %vm453_vm9, %v1754_v7, %v451_v5 }
  0xd5   : > { %344 = vrot.lane.b32.xlu1 %v342_v42, %s1573_s26 }
  0xdd   : > { %350 = vperm.xlu1 %1395, %v341_v41  }
  0xe5   : > { %487 = vrot.lane.b32.xlu1 %v377_v48, %s1574_s28 }
  0xed   : > { %574 = vrot.lane.b32.xlu1 %v377_v48, %s1575_s29 }
 0x147   : > { %v345_v50 = vpop.permute.xlu1 %344 }
 0x148   : > { %v347_v51 = vsub.f32 %v300_v38, %v345_v50 }
 0x14a   : > { %360 = vperm.xlu2 %1396, %v347_v51  }
 0x14f   : > { %v351_v55 = vpop.permute.xlu1 %350 }
 0x150   : > { %v355_v56 = vperm.slane %v351_v55, %v354_v54 }
 0x152   : > { %378 = vrot.lane.b32.xlu2 %v377_v48, %s1577_s30  ;;  %v357_v58 = vmul.f32 %v355_v56, %v1724_v0  ;;  %v640_v56 = vld [vmem:[#allocation2 + $0xc] sm:$0xf] }
 0x157   : > { %v488_v15 = vpop.permute.xlu1 %487 }
 0x158   : > { %v1762_v16 = vrot.slane %v488_v15, 4 }
 0x15a   : > { %535 = vrot.lane.b32.xlu2 %v449_v36, %s1573_s26  ;;  %v1774_v22 = vsel %vm490_vm10, %v1762_v16, %v488_v15 }
 0x15f   : > { %v575_v35 = vpop.permute.xlu1 %574 }
 0x160   : > { %v1794_v38 = vrot.slane %v575_v35, 4 }
 0x162   : > { %641 = vrot.lane.b32.xlu2 %v449_v36, %s1578_s5  ;;  %v582_v40 = vmul.f32 %v1794_v38, %v573_v37  ;;  %v1805_v47 = vsel %vm481_vm12, %v1794_v38, %v575_v35 }
 0x1a4   : > { %v361_v57 = vpop.permute.xlu2 %360 }
 0x1a5   : > { %v365_v59 = vperm.slane %v361_v57, %v354_v54 }
 0x1a7   : > { %v367_v60 = vadd.f32 %v365_v59, %v357_v58 }
 0x1a9   : > { %v1743_v61 = vmax.f32 %v367_v60, 0.0 }
 0x1ab   : > { %369 = vst [vmem:[#allocation2 + $0x4] sm:$0xff] %v1743_v61  ;;  %v581_v50 = vmul.f32 %v1805_v47, %v1743_v61 }
 0x1ac   : > { %v379_v62 = vpop.permute.xlu2 %378 }
 0x1ad   : > { %v1746_v63 = vrot.slane %v379_v62, 4 }
 0x1af   : > { %v1750_v3 = vsel %vm381_vm8, %v1746_v63, %v379_v62 }
 0x1b2   : > { %v414_v1 = vld [vmem:[#allocation2] sm:$0xff]  ;;  %v373_v2 = vld [vmem:[#allocation2 + $0x8] sm:$0xf] }
 0x1b3   : > { %v385_v4 = vmul.f32 %v414_v1, %v1750_v3  ;;  %v386_v0 = vmul.f32 %v1746_v63, %v373_v2  ;;  %v415_v6 = vld [vmem:[#allocation2 + $0x8] sm:$0xf]  ;;  %v457_v17 = vmul.f32 %v1759_v13, %v414_v1  ;;  %v494_v24 = vmul.f32 %v1774_v22, %v414_v1 }
 0x1b4   : > { %v445_v14 = vld [vmem:[#allocation2 + $0x8] sm:$0xf]  ;;  %v536_v29 = vpop.permute.xlu2 %535 }
 0x1b5   : > { %389 = vst [vmem:[#allocation1] ss:$2 sm:$0xff] %v385_v4  ;;  %v458_v20 = vmul.f32 %v1754_v7, %v445_v14  ;;  %v486_v23 = vld [vmem:[#allocation2 + $0x8] sm:$0xf]  ;;  %v1784_v31 = vrot.slane %v536_v29, 4 }
 0x1b6   : > { %391 = vst [vmem:[#allocation1 + $0x10] ss:$2 sm:$0xff] %v386_v0  ;;  %v495_v25 = vmul.f32 %v1762_v16, %v486_v23 }
 0x1b7   : > { %v543_v32 = vmul.f32 %v1784_v31, %v534_v30  ;;  %v1798_v39 = vsel %vm520_vm11, %v1784_v31, %v536_v29 }
 0x1b8   : > { %v542_v41 = vmul.f32 %v1798_v39, %v1743_v61 }
 0x1bc   : > { %v392_v8 = vld.sshfl [vmem:[#allocation1] sm:$0xff pattern:$0x75316420]  ;;  %v393_v9 = vld.sshfl [vmem:[#allocation1 + $0x8] sm:$0xff pattern:$0x75316420]  ;;  %v642_v53 = vpop.permute.xlu2 %641 }
 0x1bd   : > { %v394_v10 = vld.sshfl [vmem:[#allocation1 + $0x10] sm:$0xff pattern:$0x75316420]  ;;  %418 = vst [vmem:[#allocation1] ss:$2 sm:$0xff] %v414_v1  ;;  %v398_v11 = vpack.c.bf16 %v393_v9, %v392_v8  ;;  %v1810_v57 = vrot.slane %v642_v53, 4 }
 0x1be   : > { %420 = vst [vmem:[#allocation1 + $0x10] ss:$2 sm:$0xff] %v415_v6  ;;  %v399_v12 = vpack.c.bf16 %v394_v10, %v394_v10 }
 0x1bf   : > { %402 = vrot.lane.b32.xlu0 %v398_v11, %s1578_s5  ;;  %v649_v58 = vmul.f32 %v1810_v57, %v640_v56  ;;  %v1818_v5 = vsel %vm410_vm13, %v1810_v57, %v642_v53 }
 0x1c0   : > { %404 = vrot.lane.b32.xlu1 %v399_v12, %s1578_s5  ;;  %v648_v8 = vmul.f32 %v1818_v5, %v1743_v61 }
 0x1c4   : > { %v1765_v18 = vld.sshfl [vmem:[#allocation1] sm:$0xff pattern:$0x75316420]  ;;  %v1767_v19 = vld.sshfl [vmem:[#allocation1 + $0x8] sm:$0xff pattern:$0x75316420] }
 0x1c5   : > { %v1770_v21 = vld.sshfl [vmem:[#allocation1 + $0x10] sm:$0xff pattern:$0x75316420]  ;;  %461 = vst [vmem:[#allocation1] ss:$2 sm:$0xff] %v457_v17  ;;  %v427_v29 = vpack.c.bf16 %v1767_v19, %v1765_v18 }
 0x1c6   : > { %463 = vst [vmem:[#allocation1 + $0x10] ss:$2 sm:$0xff] %v458_v20  ;;  %v428_v6 = vpack.c.bf16 %v1770_v21, %v1770_v21 }
 0x1c7   : > { %v431_v30 = vrot.slane %v427_v29, 6 }
 0x1c8   : > { %v432_v14 = vrot.slane %v428_v6, 6 }
 0x1cc   : > { %v1778_v26 = vld.sshfl [vmem:[#allocation1] sm:$0xff pattern:$0x75316420]  ;;  %v1780_v27 = vld.sshfl [vmem:[#allocation1 + $0x8] sm:$0xff pattern:$0x75316420] }
 0x1cd   : > { %v1782_v28 = vld.sshfl [vmem:[#allocation1 + $0x10] sm:$0xff pattern:$0x75316420]  ;;  %498 = vst [vmem:[#allocation1] ss:$2 sm:$0xff] %v494_v24 }
 0x1ce   : > { %500 = vst [vmem:[#allocation1 + $0x10] ss:$2 sm:$0xff] %v495_v25 }
 0x1d4   : > { %v1787_v33 = vld.sshfl [vmem:[#allocation1] sm:$0xff pattern:$0x75316420]  ;;  %v1789_v34 = vld.sshfl [vmem:[#allocation1 + $0x8] sm:$0xff pattern:$0x75316420] }
 0x1d5   : > { %v1791_v36 = vld.sshfl [vmem:[#allocation1 + $0x10] sm:$0xff pattern:$0x75316420]  ;;  %526 = vst [vmem:[#allocation1] ss:$2 sm:$0xff] %v1743_v61  ;;  %v507_v20 = vpack.c.bf16 %v1789_v34, %v1787_v33  ;;  %v471_v34 = vpack.c.bf16 %v1782_v28, %v1782_v28 }
 0x1d6   : > { %548 = vst [vmem:[#allocation1 + $0x10] ss:$2 sm:$0xff] %v543_v32  ;;  %v470_v32 = vpack.c.bf16 %v1780_v27, %v1778_v26  ;;  %v508_v33 = vpack.c.bf16 %v1791_v36, %v1791_v36 }
 0x1d7   : > { %v511_v24 = vrot.slane %v507_v20, 6 }
 0x1d8   : > { %v512_v35 = vrot.slane %v508_v33, 6 }
 0x1dc   : > { %v527_v42 = vld.sshfl [vmem:[#allocation1] sm:$0xff pattern:$0x75316420]  ;;  %v528_v43 = vld.sshfl [vmem:[#allocation1 + $0x8] sm:$0xff pattern:$0x75316420] }
 0x1dd   : > { %546 = vst [vmem:[#allocation1] ss:$2 sm:$0xff] %v542_v41  ;;  %v551_v44 = vld.sshfl [vmem:[#allocation1 + $0x10] sm:$0xff pattern:$0x75316420]  ;;  %v531_v45 = vpack.c.bf16 %v528_v43, %v527_v42 }
 0x1de   : > { %587 = vst [vmem:[#allocation1 + $0x10] ss:$2 sm:$0xff] %v582_v40  ;;  %v556_v46 = vpack.c.bf16 %v551_v44, %v551_v44 }
 0x1df   : > { %532 = vst [vmem:[#allocation3 + $0x10] sm:$0x33] %v531_v45 }
 0x1e0   : > { %v560_v48 = vrot.slane %v556_v46, 6 }
 0x1e2   : > { %563 = vrot.lane.b32.xlu1 %v560_v48, %s1574_s28 }
 0x1e4   : > { %v549_v51 = vld.sshfl [vmem:[#allocation1] sm:$0xff pattern:$0x75316420]  ;;  %v550_v52 = vld.sshfl [vmem:[#allocation1 + $0x8] sm:$0xff pattern:$0x75316420] }
 0x1e5   : > { %v590_v54 = vld.sshfl [vmem:[#allocation1 + $0x10] sm:$0xff pattern:$0x75316420]  ;;  %585 = vst [vmem:[#allocation1] ss:$2 sm:$0xff] %v581_v50  ;;  %v555_v59 = vpack.c.bf16 %v550_v52, %v549_v51 }
 0x1e6   : > { %v595_v55 = vpack.c.bf16 %v590_v54, %v590_v54  ;;  %615 = vst [vmem:[#allocation1 + $0x10] ss:$2 sm:$0xff] %v610_v49 }
 0x1e7   : > { %v559_v4 = vrot.slane %v555_v59, 6 }
 0x1e8   : > { %600 = vrot.lane.b32.xlu0 %v595_v55, %s1572_s21 }
 0x1ec   : > { %v588_v60 = vld.sshfl [vmem:[#allocation1] sm:$0xff pattern:$0x75316420]  ;;  %v589_v62 = vld.sshfl [vmem:[#allocation1 + $0x8] sm:$0xff pattern:$0x75316420] }
 0x1ed   : > { %v594_v1 = vpack.c.bf16 %v589_v62, %v588_v60  ;;  %613 = vst [vmem:[#allocation1] ss:$2 sm:$0xff] %v1743_v61  ;;  %v618_v2 = vld.sshfl [vmem:[#allocation1 + $0x10] sm:$0xff pattern:$0x75316420] }
 0x1ee   : > { %654 = vst [vmem:[#allocation1 + $0x10] ss:$2 sm:$0xff] %v649_v58  ;;  %v623_v0 = vpack.c.bf16 %v618_v2, %v618_v2 }
 0x1ef   : > { %598 = vrot.lane.b32.xlu2 %v594_v1, %s1572_s21 }
 0x1f0   : > { %561 = vrot.lane.b32.xlu0 %v559_v4, %s1574_s28  ;;  %v627_v9 = vrot.slane %v623_v0, 6 }
 0x1f4   : > { %v616_v10 = vld.sshfl [vmem:[#allocation1] sm:$0xff pattern:$0x75316420]  ;;  %v617_v11 = vld.sshfl [vmem:[#allocation1 + $0x8] sm:$0xff pattern:$0x75316420] }
 0x1f5   : > { %v622_v12 = vpack.c.bf16 %v617_v11, %v616_v10  ;;  %652 = vst [vmem:[#allocation1] ss:$2 sm:$0xff] %v648_v8  ;;  %v657_v17 = vld.sshfl [vmem:[#allocation1 + $0x10] sm:$0xff pattern:$0x75316420] }
 0x1f6   : > { %v662_v61 = vpack.c.bf16 %v657_v17, %v657_v17  ;;  %v370_v10 = vld [vmem:[#allocation7] sm:$0xf] }
 0x1f7   : > { %630 = vrot.lane.b32.xlu2 %v627_v9, %s1580_s6  ;;  %v626_v15 = vrot.slane %v622_v12, 6  ;;  %v1582_v12 = vmov 2  }
 0x1f8   : > { %435 = vrot.lane.b32.xlu0 %v432_v14, %s1581_s7  ;;  %1397 = vset.pattern.permute.xlu2 %v1582_v12  ;;  %v1583_v12 = vmov 3  }
 0x1f9   : > { %628 = vrot.lane.b32.xlu1 %v626_v15, %s1580_s6 }
 0x1fc   : > { %v655_v21 = vld.sshfl [vmem:[#allocation1] sm:$0xff pattern:$0x75316420]  ;;  %v656_v23 = vld.sshfl [vmem:[#allocation1 + $0x8] sm:$0xff pattern:$0x75316420] }
 0x1fd   : > { %v661_v25 = vpack.c.bf16 %v656_v23, %v655_v21 }
 0x1ff   : > { %667 = vrot.lane.b32.xlu2 %v662_v61, %s1577_s30 }
 0x200   : > { %513 = vrot.lane.b32.xlu0 %v511_v24, %s1573_s26 }
 0x201   : > { %665 = vrot.lane.b32.xlu1 %v661_v25, %s1577_s30 }
 0x207   : > { %433 = vrot.lane.b32.xlu2 %v431_v30, %s1581_s7 }
 0x209   : > { %474 = vrot.lane.b32.xlu1 %v470_v32, %s1575_s29 }
 0x20f   : > { %476 = vrot.lane.b32.xlu2 %v471_v34, %s1575_s29 }
 0x211   : > { %515 = vrot.lane.b32.xlu1 %v512_v35, %s1573_s26 }
 0x217   : > { %683 = vperm.xlu2 %1397, %v370_v10  }
 0x21f   : > { %1398 = vset.pattern.permute.xlu2 %v1583_v12 }
 0x231   : > { %v403_v18 = vpop.permute.xlu0 %402 }
 0x232   : > { %v405_v19 = vpop.permute.xlu1 %404  ;;  %v406_v37 = vrot.slane %v403_v18, 4 }
 0x233   : > { %v407_v40 = vrot.slane %v405_v19, 4 }
 0x235   : > { %v409_v41 = vsel %vm307_vm0, %v406_v37, %v407_v40 }
 0x236   : > { %v411_v26 = vsel %vm410_vm13, %v403_v18, %v409_v41 }
 0x237   : > { %413 = vst [vmem:[#allocation3] sm:$0x33] %v411_v26 }
 0x249   : > { %v599_v27 = vpop.permute.xlu2 %598 }
 0x24a   : > { %v602_v43 = vrot.slane %v599_v27, 4 }
 0x251   : > { %v631_v42 = vpop.permute.xlu2 %630 }
 0x252   : > { %v633_v55 = vrot.slane %v631_v42, 4 }
 0x254   : > { %v564_v48 = vpop.permute.xlu1 %563 }
 0x255   : > { %v566_v50 = vrot.slane %v564_v48, 4 }
 0x259   : > { %v668_v45 = vpop.permute.xlu2 %667 }
 0x25a   : > { %v601_v36 = vpop.permute.xlu0 %600  ;;  %v670_v8 = vrot.slane %v668_v45, 4 }
 0x25b   : > { %v603_v44 = vrot.slane %v601_v36, 4 }
 0x25d   : > { %v604_v28 = vsel %vm307_vm0, %v602_v43, %v603_v44 }
 0x25e   : > { %v606_v46 = vsel %vm453_vm9, %v599_v27, %v604_v28 }
 0x25f   : > { %608 = vst [vmem:[#allocation3 + $0x18] sm:$0x33] %v606_v46 }
 0x261   : > { %v434_v54 = vpop.permute.xlu2 %433 }
 0x262   : > { %v562_v49 = vpop.permute.xlu0 %561  ;;  %v437_v58 = vrot.slane %v434_v54, 4 }
 0x263   : > { %v565_v51 = vrot.slane %v562_v49, 4 }
 0x265   : > { %v567_v52 = vsel %vm307_vm0, %v565_v51, %v566_v50  ;;  %v371_v51 = vld [vmem:[#allocation9] sm:$0x3] }
 0x266   : > { %v569_v53 = vsel %vm490_vm10, %v562_v49, %v567_v52 }
 0x267   : > { %571 = vst [vmem:[#allocation3 + $0x10] sm:$0xcc] %v569_v53 }
 0x269   : > { %v477_v15 = vpop.permute.xlu2 %476 }
 0x26a   : > { %v436_v56 = vpop.permute.xlu0 %435  ;;  %v479_v20 = vrot.slane %v477_v15, 4 }
 0x26b   : > { %v438_v59 = vrot.slane %v436_v56, 4  ;;  %v629_v60 = vpop.permute.xlu1 %628 }
 0x26c   : > { %v632_v62 = vrot.slane %v629_v60, 4 }
 0x26d   : > { %v439_v1 = vsel %vm307_vm0, %v437_v58, %v438_v59 }
 0x26e   : > { %v441_v2 = vsel %vm440_vm14, %v434_v54, %v439_v1  ;;  %v634_v4 = vsel %vm307_vm0, %v632_v62, %v633_v55  ;;  %v1271_v27 = vld [vmem:[#allocation3 + $0x10] sm:$0xf]  ;;  %v1305_v42 = vld [vmem:[#allocation3 + $0x14] sm:$0xf] }
 0x26f   : > { %443 = vst [vmem:[#allocation3] sm:$0xcc] %v441_v2  ;;  %v636_v0 = vsel %vm635_vm15, %v629_v60, %v634_v4 }
 0x270   : > { %638 = vst [vmem:[#allocation3 + $0x18] sm:$0xcc] %v636_v0 }
 0x271   : > { %v684_v52 = vpop.permute.xlu2 %683 }
 0x272   : > { %v514_v30 = vpop.permute.xlu0 %513 }
 0x273   : > { %v666_v6 = vpop.permute.xlu1 %665  ;;  %v517_v18 = vrot.slane %v514_v30, 4 }
 0x274   : > { %v669_v9 = vrot.slane %v666_v6, 4 }
 0x276   : > { %v671_v11 = vsel %vm307_vm0, %v669_v9, %v670_v8  ;;  %v1263_v28 = vld [vmem:[#allocation3] sm:$0xf]  ;;  %v1303_v46 = vld [vmem:[#allocation3 + $0x4] sm:$0xf] }
 0x277   : > { %v673_v14 = vsel %vm381_vm8, %v666_v6, %v671_v11  ;;  %v1306_v35 = vld [vmem:[#allocation3 + $0x14] sm:$0xf0]  ;;  %v1273_v41 = vld [vmem:[#allocation3 + $0x18] sm:$0xf0] }
 0x278   : > { %675 = vst [vmem:[#allocation3 + $0x20] sm:$0x33] %v673_v14  ;;  %v1272_v43 = vor.u32 %v1306_v35, %v1271_v27  ;;  %v1276_v44 = vor.u32 %v1305_v42, %v1273_v41 }
 0x27b   : > { %v475_v17 = vpop.permute.xlu1 %474 }
 0x27c   : > { %v478_v61 = vrot.slane %v475_v17, 4 }
 0x27e   : > { %v480_v21 = vsel %vm307_vm0, %v478_v61, %v479_v20 }
 0x27f   : > { %v482_v23 = vsel %vm481_vm12, %v475_v17, %v480_v21  ;;  %v680_v24 = vld [vmem:[#allocation3 + $0x20] sm:$0x33] }
 0x280   : > { %484 = vst [vmem:[#allocation3 + $0x8] sm:$0x33] %v482_v23  ;;  %v699_v25 = vunpack.c.l.b16 %v680_v24  ;;  %v700_v29 = vunpack.c.h.b16 %v680_v24 }
 0x282   : > { %v705_v32 = vpack.c.b16 %v699_v25, %v699_v25  ;;  %v706_v33 = vpack.c.b16 %v700_v29, %v700_v29 }
 0x283   : > { %v516_v34 = vpop.permute.xlu1 %515 }
 0x284   : > { %v518_v19 = vrot.slane %v516_v34, 4  ;;  %v717_v37 = vsel %vm715_vm1, %v705_v32, 0  ;;  %v720_v40 = vsel %vm715_vm1, %v706_v33, 0 }
 0x285   : > { %727 = vmatpush.bf16.msra.mxu0 %v717_v37  ;;  %740 = vmatpush.bf16.msra.mxu1 %v720_v40 }
 0x286   : > { %v519_v26 = vsel %vm307_vm0, %v517_v18, %v518_v19  ;;  %v1584_v18 = vmov 4  }
 0x287   : > { %v521_v36 = vsel %vm520_vm11, %v514_v30, %v519_v26  ;;  %v748_v30 = vld [vmem:[#allocation7] sm:$0xf] }
 0x288   : > { %523 = vst [vmem:[#allocation3 + $0x8] sm:$0xcc] %v521_v36 }
 0x289   : > { %728 = vmatpush.bf16.msra.mxu0 %v1272_v43  ;;  %741 = vmatpush.bf16.msra.mxu1 %v1276_v44 }
 0x28f   : > { %v1304_v45 = vld [vmem:[#allocation3 + $0x4] sm:$0xf0]  ;;  %v1265_v48 = vld [vmem:[#allocation3 + $0x8] sm:$0xf0] }
 0x290   : > { %v1264_v49 = vor.u32 %v1304_v45, %v1263_v28  ;;  %v1268_v50 = vor.u32 %v1303_v46, %v1265_v48 }
 0x292   : > { %729 = vmatpush.bf16.msra.mxu0 %v1264_v49  ;;  %742 = vmatpush.bf16.msra.mxu1 %v1268_v50 }
 0x295   : > { %1277 = vmatmul.msk.bf16.vlgmr.msra.gmra.mxu0 %vm711_vm2, %v371_v51  ;;  %1278 = vmatmul.msk.bf16.vlgmr.msra.gmra.mxu1 %vm711_vm2, %v371_v51 }
 0x312   : > { %v731_v53 = vpop.f32.mrf.mxu0  ;;  %v744_v54 = vpop.f32.mrf.mxu1 }
 0x313   : > { %v732_v55 = vadd.f32 %v731_v53, %v684_v52  ;;  %v745_v56 = vadd.f32 %v744_v54, %v684_v52 }
 0x315   : > { %v749_v58 = vsel %vm307_vm0, %v732_v55, 0.0  ;;  %v750_v59 = vsel %vm307_vm0, %v745_v56, 0.0  ;;  %v754_v60 = vmul.f32 %v732_v55, %v732_v55  ;;  %v755_v62 = vmul.f32 %v745_v56, %v745_v56 }
 0x316   : > { %v751_v1 = vadd.f32 %v750_v59, %v749_v58 }
 0x317   : > { %v756_v2 = vsel %vm307_vm0, %v754_v60, 0.0  ;;  %v757_v4 = vsel %vm307_vm0, %v755_v62, 0.0 }
 0x318   : > { %752 = vadd.xlane.f32.xlu0 %v751_v1  ;;  %v758_v0 = vadd.f32 %v757_v4, %v756_v2 }
 0x31a   : > { %v733_v6 = vpop.f32.mrf.mxu0  ;;  %v746_v8 = vpop.f32.mrf.mxu1  ;;  %759 = vadd.xlane.f32.xlu1 %v758_v0 }
 0x38b   : > { %v753_v9 = vpop.xlane.xlu0 %752 }
 0x38c   : > { %v761_v10 = vmul.f32 0.00390625, %v753_v9 }
 0x38d   : > { %v760_v11 = vpop.xlane.xlu1 %759 }
 0x38e   : > { %v763_v14 = vmul.f32 %v761_v10, %v761_v10  ;;  %v762_v15 = vmul.f32 0.00390625, %v760_v11 }
 0x390   : > { %v764_v17 = vsub.f32 %v762_v15, %v763_v14  ;;  %v967_v15 = vld [vmem:[#allocation2 + $0xc] sm:$0xf] }
 0x392   : > { %v765_v20 = vmax.f32 %v764_v17, 0.0 }
 0x394   : > { %v766_v61 = vadd.f32 1e-05, %v765_v20 }
 0x396   : > { %1404 = vrsqrt.f32 %v766_v61  ;;  %vm773_vm4 = vweird.f32 %v766_v61 }
 0x39c   : > { %v1405_v21 = vpop.eup %1404 }
 0x39d   : > { %v768_v23 = vmul.f32 %v1405_v21, %v766_v61  ;;  %vm774_vm3 = vweird.f32 %v1405_v21 }
 0x39e   : > { %vm775_vm5 = vmor %vm773_vm4, %vm774_vm3 }
 0x39f   : > { %v769_v24 = vmul.f32 %v1405_v21, %v768_v23 }
 0x3a1   : > { %v770_v25 = vmul.f32 0.5, %v769_v24  ;;  %v996_v24 = vld [vmem:[#allocation2 + $0xc] sm:$0xf] }
 0x3a3   : > { %v771_v29 = vsub.f32 1.5, %v770_v25 }
 0x3a5   : > { %v772_v32 = vmul.f32 %v1405_v21, %v771_v29 }
 0x3a7   : > { %v776_v33 = vsel %vm775_vm5, %v1405_v21, %v772_v32 }
 0x3a8   : > { %v777_v34 = vmul.f32 %v776_v33, %v748_v30 }
 0x3aa   : > { %v778_v35 = vmul.f32 %v777_v34, %v761_v10 }
 0x3ac   : > { %780 = vrot.lane.b32.xlu2 %v778_v35, %s1573_s26 }
 0x3b4   : > { %786 = vperm.xlu2 %1398, %v777_v34   ;;  %v1025_v34 = vld [vmem:[#allocation2 + $0xc] sm:$0xf] }
 0x3b5   : > { %v1027_v35 = vmul.f32 %v1025_v34, %v1810_v57 }
 0x3bc   : > { %1399 = vset.pattern.permute.xlu2 %v1584_v18 }
 0x406   : > { %v781_v19 = vpop.permute.xlu2 %780 }
 0x407   : > { %v783_v37 = vsub.f32 %v748_v30, %v781_v19 }
 0x409   : > { %793 = vperm.xlu2 %1399, %v783_v37  }
 0x40e   : > { %v787_v40 = vpop.permute.xlu2 %786 }
 0x40f   : > { %v789_v41 = vmul.f32 %v787_v40, %v732_v55  ;;  %v790_v26 = vmul.f32 %v787_v40, %v745_v56 }
 0x463   : > { %v794_v27 = vpop.permute.xlu2 %793 }
 0x464   : > { %v796_v42 = vadd.f32 %v794_v27, %v789_v41  ;;  %v797_v36 = vadd.f32 %v794_v27, %v790_v26 }
 0x466   : > { %v799_v43 = vmax.f32 %v797_v36, 0.0  ;;  %v798_v44 = vmax.f32 %v796_v42, 0.0 }
 0x468   : > { %v802_v28 = vrot.slane %v799_v43, 4 }
 0x46a   : > { %v1871_v45 = vsel %vm307_vm0, %v798_v44, %v802_v28 }
 0x46b   : > { %805 = vst [vmem:[#allocation2 + $0x4] sm:$0xff] %v1871_v45  ;;  %v968_v25 = vmul.f32 %v1871_v45, %v1805_v47  ;;  %v1026_v26 = vmul.f32 %v1871_v45, %v1818_v5 }
 0x472   : > { %v808_v46 = vld [vmem:[#allocation2] sm:$0xff]  ;;  %v809_v48 = vld [vmem:[#allocation2 + $0x8] sm:$0xf] }
 0x473   : > { %v810_v49 = vmul.f32 %v808_v46, %v1750_v3  ;;  %v811_v50 = vmul.f32 %v809_v48, %v1746_v63  ;;  %v838_v51 = vld [vmem:[#allocation2 + $0x8] sm:$0xf]  ;;  %v868_v59 = vmul.f32 %v808_v46, %v1759_v13  ;;  %v897_v0 = vmul.f32 %v808_v46, %v1774_v22 }
 0x474   : > { %v867_v58 = vld [vmem:[#allocation2 + $0x8] sm:$0xf]  ;;  %v969_v22 = vmul.f32 %v967_v15, %v1794_v38 }
 0x475   : > { %814 = vst [vmem:[#allocation1] ss:$2 sm:$0xff] %v810_v49  ;;  %v869_v3 = vmul.f32 %v867_v58, %v1754_v7  ;;  %v896_v4 = vld [vmem:[#allocation2 + $0x8] sm:$0xf]  ;;  %v936_v7 = vld [vmem:[#allocation2 + $0xc] sm:$0xf] }
 0x476   : > { %816 = vst [vmem:[#allocation1 + $0x10] ss:$2 sm:$0xff] %v811_v50  ;;  %v898_v6 = vmul.f32 %v896_v4, %v1762_v16  ;;  %v938_v10 = vmul.f32 %v936_v7, %v1784_v31  ;;  %v937_v16 = vmul.f32 %v1871_v45, %v1798_v39 }
 0x47c   : > { %v817_v52 = vld.sshfl [vmem:[#allocation1] sm:$0xff pattern:$0x75316420]  ;;  %v818_v53 = vld.sshfl [vmem:[#allocation1 + $0x8] sm:$0xff pattern:$0x75316420] }
 0x47d   : > { %v819_v54 = vld.sshfl [vmem:[#allocation1 + $0x10] sm:$0xff pattern:$0x75316420]  ;;  %v823_v55 = vpack.c.bf16 %v818_v53, %v817_v52  ;;  %841 = vst [vmem:[#allocation1] ss:$2 sm:$0xff] %v808_v46 }
 0x47e   : > { %v824_v56 = vpack.c.bf16 %v819_v54, %v819_v54  ;;  %843 = vst [vmem:[#allocation1 + $0x10] ss:$2 sm:$0xff] %v838_v51 }
 0x47f   : > { %827 = vrot.lane.b32.xlu2 %v823_v55, %s1578_s5 }
 0x480   : > { %829 = vrot.lane.b32.xlu0 %v824_v56, %s1578_s5  ;;  %s1516_s5 = scalar_lea.hbm %s1981_s4, 16 }
 0x484   : > { %v844_v63 = vld.sshfl [vmem:[#allocation1] sm:$0xff pattern:$0x75316420]  ;;  %v845_v60 = vld.sshfl [vmem:[#allocation1 + $0x8] sm:$0xff pattern:$0x75316420] }
 0x485   : > { %v1880_v62 = vld.sshfl [vmem:[#allocation1 + $0x10] sm:$0xff pattern:$0x75316420]  ;;  %v850_v1 = vpack.c.bf16 %v845_v60, %v844_v63  ;;  %872 = vst [vmem:[#allocation1] ss:$2 sm:$0xff] %v868_v59 }
 0x486   : > { %874 = vst [vmem:[#allocation1 + $0x10] ss:$2 sm:$0xff] %v869_v3  ;;  %v851_v51 = vpack.c.bf16 %v1880_v62, %v1880_v62 }
 0x487   : > { %v854_v2 = vrot.slane %v850_v1, 6 }
 0x488   : > { %v855_v52 = vrot.slane %v851_v51, 6 }
 0x489   : > { %856 = vrot.lane.b32.xlu1 %v854_v2, %s1581_s7 }
 0x48c   : > { %v875_v8 = vld.sshfl [vmem:[#allocation1] sm:$0xff pattern:$0x75316420]  ;;  %v876_v9 = vld.sshfl [vmem:[#allocation1 + $0x8] sm:$0xff pattern:$0x75316420] }
 0x48d   : > { %v877_v13 = vld.sshfl [vmem:[#allocation1 + $0x10] sm:$0xff pattern:$0x75316420]  ;;  %901 = vst [vmem:[#allocation1] ss:$2 sm:$0xff] %v897_v0  ;;  %v881_v44 = vpack.c.bf16 %v876_v9, %v875_v8 }
 0x48e   : > { %903 = vst [vmem:[#allocation1 + $0x10] ss:$2 sm:$0xff] %v898_v6  ;;  %v882_v36 = vpack.c.bf16 %v877_v13, %v877_v13 }
 0x494   : > { %v1886_v11 = vld.sshfl [vmem:[#allocation1] sm:$0xff pattern:$0x75316420]  ;;  %v1888_v12 = vld.sshfl [vmem:[#allocation1 + $0x8] sm:$0xff pattern:$0x75316420] }
 0x495   : > { %928 = vst [vmem:[#allocation1] ss:$2 sm:$0xff] %v1871_v45  ;;  %v906_v14 = vld.sshfl [vmem:[#allocation1 + $0x10] sm:$0xff pattern:$0x75316420]  ;;  %v910_v53 = vpack.c.bf16 %v1888_v12, %v1886_v11 }
 0x496   : > { %943 = vst [vmem:[#allocation1 + $0x10] ss:$2 sm:$0xff] %v938_v10  ;;  %v911_v46 = vpack.c.bf16 %v906_v14, %v906_v14 }
 0x497   : > { %v914_v54 = vrot.slane %v910_v53, 6 }
 0x498   : > { %v915_v49 = vrot.slane %v911_v46, 6 }
 0x49c   : > { %v929_v17 = vld.sshfl [vmem:[#allocation1] sm:$0xff pattern:$0x75316420]  ;;  %v930_v20 = vld.sshfl [vmem:[#allocation1 + $0x8] sm:$0xff pattern:$0x75316420] }
 0x49d   : > { %v946_v61 = vld.sshfl [vmem:[#allocation1 + $0x10] sm:$0xff pattern:$0x75316420]  ;;  %941 = vst [vmem:[#allocation1] ss:$2 sm:$0xff] %v937_v16  ;;  %v933_v21 = vpack.c.bf16 %v930_v20, %v929_v17 }
 0x49e   : > { %v951_v31 = vpack.c.bf16 %v946_v61, %v946_v61  ;;  %974 = vst [vmem:[#allocation1 + $0x10] ss:$2 sm:$0xff] %v969_v22 }
 0x49f   : > { %934 = vst [vmem:[#allocation3 + $0x10] sm:$0x33] %v933_v21 }
 0x4a0   : > { %v955_v23 = vrot.slane %v951_v31, 6 }
 0x4a2   : > { %958 = vrot.lane.b32.xlu2 %v955_v23, %s1574_s28  ;;  %v806_v23 = vld [vmem:[#allocation7] sm:$0xf] }
 0x4a4   : > { %v944_v29 = vld.sshfl [vmem:[#allocation1] sm:$0xff pattern:$0x75316420]  ;;  %v945_v30 = vld.sshfl [vmem:[#allocation1 + $0x8] sm:$0xff pattern:$0x75316420] }
 0x4a5   : > { %v950_v39 = vpack.c.bf16 %v945_v30, %v944_v29  ;;  %972 = vst [vmem:[#allocation1] ss:$2 sm:$0xff] %v968_v25  ;;  %v977_v38 = vld.sshfl [vmem:[#allocation1 + $0x10] sm:$0xff pattern:$0x75316420]  ;;  %v1585_v25 = vmov 5  }
 0x4a6   : > { %1001 = vst [vmem:[#allocation1 + $0x10] ss:$2 sm:$0xff] %v996_v24  ;;  %v982_v33 = vpack.c.bf16 %v977_v38, %v977_v38  ;;  %1400 = vset.pattern.permute.xlu1 %v1585_v25  ;;  %1401 = vset.pattern.permute.xlu0 %v1585_v25 }
 0x4a7   : > { %v954_v32 = vrot.slane %v950_v39, 6 }
 0x4a9   : > { %956 = vrot.lane.b32.xlu0 %v954_v32, %s1574_s28 }
 0x4aa   : > { %987 = vrot.lane.b32.xlu2 %v982_v33, %s1572_s21 }
 0x4ac   : > { %v975_v18 = vld.sshfl [vmem:[#allocation1] sm:$0xff pattern:$0x75316420]  ;;  %v976_v19 = vld.sshfl [vmem:[#allocation1 + $0x8] sm:$0xff pattern:$0x75316420] }
 0x4ad   : > { %v981_v37 = vpack.c.bf16 %v976_v19, %v975_v18  ;;  %999 = vst [vmem:[#allocation1] ss:$2 sm:$0xff] %v1871_v45  ;;  %v1004_v47 = vld.sshfl [vmem:[#allocation1 + $0x10] sm:$0xff pattern:$0x75316420] }
 0x4ae   : > { %v1009_v40 = vpack.c.bf16 %v1004_v47, %v1004_v47  ;;  %1032 = vst [vmem:[#allocation1 + $0x10] ss:$2 sm:$0xff] %v1027_v35 }
 0x4af   : > { %985 = vrot.lane.b32.xlu1 %v981_v37, %s1572_s21  ;;  %s244_s21 = scalar_lea.vmem [#allocation10], %s1253_s24 }
 0x4b0   : > { %v1013_v41 = vrot.slane %v1009_v40, 6 }
 0x4b2   : > { %1016 = vrot.lane.b32.xlu0 %v1013_v41, %s1580_s6 }
 0x4b4   : > { %v1002_v27 = vld.sshfl [vmem:[#allocation1] sm:$0xff pattern:$0x75316420]  ;;  %v1003_v42 = vld.sshfl [vmem:[#allocation1 + $0x8] sm:$0xff pattern:$0x75316420] }
 0x4b5   : > { %v1035_v57 = vld.sshfl [vmem:[#allocation1 + $0x10] sm:$0xff pattern:$0x75316420]  ;;  %1030 = vst [vmem:[#allocation1] ss:$2 sm:$0xff] %v1026_v26  ;;  %v1008_v28 = vpack.c.bf16 %v1003_v42, %v1002_v27 }
 0x4b6   : > { %v1040_v43 = vpack.c.bf16 %v1035_v57, %v1035_v57 }
 0x4b7   : > { %887 = vrot.lane.b32.xlu1 %v882_v36, %s1575_s29  ;;  %v1012_v48 = vrot.slane %v1008_v28, 6 }
 0x4b8   : > { %1045 = vrot.lane.b32.xlu2 %v1040_v43, %s1577_s30 }
 0x4ba   : > { %885 = vrot.lane.b32.xlu0 %v881_v44, %s1575_s29 }
 0x4bc   : > { %v1033_v5 = vld.sshfl [vmem:[#allocation1] sm:$0xff pattern:$0x75316420]  ;;  %v1034_v45 = vld.sshfl [vmem:[#allocation1 + $0x8] sm:$0xff pattern:$0x75316420] }
 0x4bd   : > { %v1039_v50 = vpack.c.bf16 %v1034_v45, %v1033_v5 }
 0x4bf   : > { %1060 = vperm.xlu1 %1400, %v806_v23  }
 0x4c0   : > { %1014 = vrot.lane.b32.xlu2 %v1012_v48, %s1580_s6 }
 0x4c2   : > { %918 = vrot.lane.b32.xlu0 %v915_v49, %s1573_s26 }
 0x4c8   : > { %1043 = vrot.lane.b32.xlu2 %v1039_v50, %s1577_s30 }
 0x4d0   : > { %858 = vrot.lane.b32.xlu2 %v855_v52, %s1581_s7 }
 0x4d8   : > { %916 = vrot.lane.b32.xlu2 %v914_v54, %s1573_s26  ;;  %s1152_s26 = sshll.u32 %s244_s21, 4  ;;  %s1153_s26 = int_to_ptr.vmem [resolvable:$true] %s1152_s26 }
 0x4d9   : > { %v828_v55 = vpop.permute.xlu2 %827 }
 0x4da   : > { %v831_v58 = vrot.slane %v828_v55, 4 }
 0x4f2   : > { %v830_v56 = vpop.permute.xlu0 %829 }
 0x4f3   : > { %v832_v59 = vrot.slane %v830_v56, 4 }
 0x4f5   : > { %v833_v3 = vsel %vm307_vm0, %v831_v58, %v832_v59 }
 0x4f6   : > { %v834_v63 = vsel %vm410_vm13, %v828_v55, %v833_v3 }
 0x4f7   : > { %836 = vst [vmem:[#allocation3] sm:$0x33] %v834_v63  ;;  %v807_v63 = vld [vmem:[%s1980_s3] sm:$0x3] }
 0x4fb   : > { %v857_v2 = vpop.permute.xlu1 %856 }
 0x4fc   : > { %v959_v60 = vpop.permute.xlu2 %958  ;;  %v860_v38 = vrot.slane %v857_v2, 4 }
 0x4fd   : > { %v961_v6 = vrot.slane %v959_v60, 4  ;;  %v1123_v60 = vld [vmem:[%s1713_s27] sm:$0xff]  ;;  %s1154_s27 = sshll.u32 %s1150_s25, 4  ;;  %s1155_s27 = int_to_ptr.hbm [resolvable:$true] %s1154_s27 }
 0x4fe   : > { %1125 = vst [vmem:[#allocation1] ss:$2 sm:$0xff] %v1123_v60  ;;  %s1510_s28 = sshra.s32 %s1155_s27, 4  ;;  %s1511_s28 = int_to_ptr.hbm [resolvable:$true] %s1510_s28 }
 0x4ff   : > { %s1512_s29 = scalar_lea.hbm %s1511_s28, 8  ;;  %p1517_p9 = scmp.lt.s32.totalorder %s1511_s28, %s1981_s4 }
 0x500   : > { %p1513_p1 = scmp.ne.s32.totalorder %s1511_s28, %s1512_s29  ;;  %p1518_p2 = scmp.lt.s32.totalorder %s1516_s5, %s1512_s29 }
 0x502   : > { %p1514_p4 = pnand %p1513_p1, %p1677_p3  ;;  %p1519_p10 = por %p1518_p2, %p1517_p9 }
 0x504   : > { %v988_v62 = vpop.permute.xlu2 %987  ;;  %p1515_p8 = pneg %p1514_p4 }
 0x505   : > { %v990_v10 = vrot.slane %v988_v62, 4 }
 0x506   : > { %p1520_p11 = pnand %p1519_p10, %p1515_p8 }
 0x512   : > { %v1046_v1 = vpop.permute.xlu2 %1045 }
 0x513   : > { %v1048_v14 = vrot.slane %v1046_v1, 4 }
 0x51a   : > { %v1015_v4 = vpop.permute.xlu2 %1014 }
 0x51b   : > { %v957_v0 = vpop.permute.xlu0 %956  ;;  %v1018_v17 = vrot.slane %v1015_v4, 4 }
 0x51c   : > { %v960_v8 = vrot.slane %v957_v0, 4 }
 0x51e   : > { %v962_v9 = vsel %vm307_vm0, %v960_v8, %v961_v6  ;;  %v1126_v8 = vld.sshfl [vmem:[#allocation1] sm:$0xff pattern:$0x75316420] }
 0x51f   : > { %v963_v13 = vsel %vm490_vm10, %v957_v0, %v962_v9 }
 0x520   : > { %965 = vst [vmem:[#allocation3 + $0x10] sm:$0xcc] %v963_v13 }
 0x521   : > { %v986_v7 = vpop.permute.xlu1 %985 }
 0x522   : > { %v989_v11 = vrot.slane %v986_v7, 4  ;;  %v1044_v12 = vpop.permute.xlu2 %1043 }
 0x523   : > { %v1047_v15 = vrot.slane %v1044_v12, 4 }
 0x524   : > { %v991_v16 = vsel %vm307_vm0, %v989_v11, %v990_v10  ;;  %v1017_v22 = vpop.permute.xlu0 %1016 }
 0x525   : > { %v992_v20 = vsel %vm453_vm9, %v986_v7, %v991_v16  ;;  %v1049_v61 = vsel %vm307_vm0, %v1047_v15, %v1048_v14  ;;  %v1019_v21 = vrot.slane %v1017_v22, 4 }
 0x526   : > { %994 = vst [vmem:[#allocation3 + $0x18] sm:$0x33] %v992_v20  ;;  %v1050_v31 = vsel %vm381_vm8, %v1044_v12, %v1049_v61 }
 0x527   : > { %1052 = vst [vmem:[#allocation3 + $0x20] sm:$0x33] %v1050_v31  ;;  %v1020_v24 = vsel %vm307_vm0, %v1018_v17, %v1019_v21  ;;  %v1289_v5 = vld [vmem:[#allocation3 + $0x10] sm:$0xf]  ;;  %v1309_v45 = vld [vmem:[#allocation3 + $0x14] sm:$0xf] }
 0x528   : > { %v1021_v29 = vsel %vm635_vm15, %v1015_v4, %v1020_v24  ;;  %v1127_v4 = vld.sshfl [vmem:[#allocation1 + $0x8] sm:$0xff pattern:$0x75316420] }
 0x529   : > { %1023 = vst [vmem:[#allocation3 + $0x18] sm:$0xcc] %v1021_v29  ;;  %v888_v30 = vpop.permute.xlu1 %887 }
 0x52a   : > { %v859_v39 = vpop.permute.xlu2 %858  ;;  %v890_v34 = vrot.slane %v888_v30, 4 }
 0x52b   : > { %v861_v32 = vrot.slane %v859_v39, 4 }
 0x52c   : > { %v886_v33 = vpop.permute.xlu0 %885 }
 0x52d   : > { %v862_v35 = vsel %vm307_vm0, %v860_v38, %v861_v32  ;;  %v889_v18 = vrot.slane %v886_v33, 4 }
 0x52e   : > { %v863_v19 = vsel %vm440_vm14, %v857_v2, %v862_v35  ;;  %v1057_v37 = vld [vmem:[#allocation3 + $0x20] sm:$0x33] }
 0x52f   : > { %865 = vst [vmem:[#allocation3] sm:$0xcc] %v863_v19  ;;  %v891_v47 = vsel %vm307_vm0, %v889_v18, %v890_v34  ;;  %v1076_v40 = vunpack.c.l.b16 %v1057_v37  ;;  %v1077_v41 = vunpack.c.h.b16 %v1057_v37 }
 0x530   : > { %v892_v26 = vsel %vm481_vm12, %v886_v33, %v891_v47  ;;  %v1310_v44 = vld [vmem:[#allocation3 + $0x14] sm:$0xf0]  ;;  %v1291_v28 = vld [vmem:[#allocation3 + $0x18] sm:$0xf0] }
 0x531   : > { %894 = vst [vmem:[#allocation3 + $0x8] sm:$0x33] %v892_v26  ;;  %v1082_v27 = vpack.c.b16 %v1076_v40, %v1076_v40  ;;  %v1083_v42 = vpack.c.b16 %v1077_v41, %v1077_v41  ;;  %v1290_v50 = vor.u32 %v1310_v44, %v1289_v5  ;;  %v1294_v51 = vor.u32 %v1309_v45, %v1291_v28  ;;  %v1061_v62 = vpop.permute.xlu1 %1060 }
 0x532   : > { %v917_v36 = vpop.permute.xlu2 %916 }
 0x533   : > { %v1092_v57 = vsel %vm715_vm1, %v1082_v27, 0  ;;  %v1095_v43 = vsel %vm715_vm1, %v1083_v42, 0  ;;  %v920_v48 = vrot.slane %v917_v36, 4 }
 0x534   : > { %v919_v46 = vpop.permute.xlu0 %918  ;;  %1102 = vmatpush.bf16.msra.mxu2 %v1092_v57  ;;  %1115 = vmatpush.bf16.msra.mxu3 %v1095_v43 }
 0x535   : > { %v921_v49 = vrot.slane %v919_v46, 4 }
 0x536   : > { %v1281_v54 = vld [vmem:[#allocation3] sm:$0xf]  ;;  %v1307_v56 = vld [vmem:[#allocation3 + $0x4] sm:$0xf] }
 0x537   : > { %v922_v52 = vsel %vm307_vm0, %v920_v48, %v921_v49 }
 0x538   : > { %v923_v53 = vsel %vm520_vm11, %v917_v36, %v922_v52  ;;  %1103 = vmatpush.bf16.msra.mxu2 %v1290_v50  ;;  %1116 = vmatpush.bf16.msra.mxu3 %v1294_v51 }
 0x539   : > { %925 = vst [vmem:[#allocation3 + $0x8] sm:$0xcc] %v923_v53 }
 0x540   : > { %v1308_v55 = vld [vmem:[#allocation3 + $0x4] sm:$0xf0]  ;;  %v1283_v58 = vld [vmem:[#allocation3 + $0x8] sm:$0xf0] }
 0x541   : > { %v1282_v59 = vor.u32 %v1308_v55, %v1281_v54  ;;  %v1286_v3 = vor.u32 %v1307_v56, %v1283_v58 }
 0x543   : > { %1104 = vmatpush.bf16.msra.mxu2 %v1282_v59  ;;  %1117 = vmatpush.bf16.msra.mxu3 %v1286_v3 }
 0x546   : > { %1295 = vmatmul.msk.bf16.vlgmr.msra.gmra.mxu2 %vm711_vm2, %v807_v63  ;;  %1296 = vmatmul.msk.bf16.vlgmr.msra.gmra.mxu3 %vm711_vm2, %v807_v63 }
 0x5c9   : > { %v1106_v1 = vpop.f32.mrf.mxu2  ;;  %v1119_v2 = vpop.f32.mrf.mxu3 }
 0x5ca   : > { %v1107_v0 = vadd.f32 %v1106_v1, %v1061_v62  ;;  %v1120_v6 = vadd.f32 %v1119_v2, %v1061_v62 }
 0x5cc   : > { %v1131_v9 = vadd.f32 %v1127_v4, %v1120_v6  ;;  %v1130_v13 = vadd.f32 %v1126_v8, %v1107_v0 }
 0x5ce   : > { %v1134_v7 = vrot.slane %v1131_v9, 4 }
 0x5d0   : > { %v1135_v10 = vsel %vm307_vm0, %v1130_v13, %v1134_v7 }
 0x5d1   : > { %v1108_v11 = vpop.f32.mrf.mxu2  ;;  %v1121_v12 = vpop.f32.mrf.mxu3  ;;  %1137 = vst [vmem:[%s244_s21] sm:$0xff] %v1135_v10 }
 0x5d2   : > { %1523 = shalt.err (!%p1520_p11)
}
 0x5d3   : > { %1322 = dma.vmem_to_hbm [thread:$0]  (%p1677_p3), %s1153_s26, 128, %s1155_s27, %s1139_s19  }
 0x5d4 PF: > { %s1166_s13 = sand.u32 1, %s1554_s15   ;;  %p1987_p12 = scmp.ge.s32.totalorder %s1566_s18, 2 }
 0x5d5   : > { %s1167_s9 = scalar_lea.sflag [#allocation6], %s1166_s13 }
 0x5d6   : > { %p1336_p13 = pnand %p1987_p12, %p1646_p6 }
 0x5d8   : > { %p1337_p0 = pneg %p1336_p13 }
 0x5da   : > { %1549 = dma.done.wait (%p1337_p0), %s1167_s9, 128  }
 0x5db   : > { %1551 = vsyncadd (%p1337_p0), %s1167_s9, 4294967168  ;;  %p18_p5 = scmp.ge.s32.totalorder %s1667_s8, 4   ;;  %s1988_s15 = smov %s1558_s16 }
 0x5dc   : > { %s1989_s16 = smov %s1562_s17  ;;  %s1990_s17 = smov %s1683_s12 }
 0x5dd   : > { %s1991_s18 = smov %s1667_s8  ;;  %20 = sbr.rel (!%p18_p5) target bundleno = 6 (0x6), region = 105 }
 0x5e2   :  { %1173 = vsyncpa [#allocation5], 1 }
 0x5e3   :  { %1175 = vsyncpa [#allocation5 + $0x1], 1 }
 0x5e4   :  { %1176 = vsyncpa [#allocation8], 1 }
 0x5e5   :  { %1177 = vsyncpa [#allocation6], 1 }
 0x5e6   :  { %1179 = vsyncpa [#allocation6 + $0x1], 1 }

</bundles_post_ra>
